<compile_context>
chip_gen: v5e
topology: v5e:2x2
jax: 0.10.0
libtpu: 0.0.40
codegen_flags: <defaults>
</compile_context>

<pallas_src>
import functools

import jax
import jax.numpy as jnp
from jax.experimental import pallas as pl
from jax.experimental.pallas import tpu as pltpu

INPUT_DIM = 784
HIDDEN = [256, 128, 64]
OUTPUT_DIM = 1
PADDED_OUT = 128  # lane-dense output width (64->1 head padded with zero columns)


def _round_up(n, m):
    return ((n + m - 1) // m) * m


def _choose_tile(padded_b, batch_tile):
    """Largest tile (<= batch_tile) dividing padded_b that leaves >= 2 grid steps if possible.

    >= 2 grid steps lets the 'parallel' batch axis shard across both v7x TensorCores; on
    v5e/v6e (1 TC) the extra step is harmless. padded_b is always a multiple of 64.
    """
    candidates = [t for t in (1024, 512, 256, 128, 64) if t <= batch_tile]
    for t in candidates:
        if padded_b % t == 0 and padded_b // t >= 2:
            return t
    for t in candidates:
        if padded_b % t == 0:
            return t
    return padded_b


def _disc_kernel(x_ref, w1_ref, b1_ref, w2_ref, b2_ref, w3_ref, b3_ref,
                 w4_ref, b4_ref, o_ref):
    # Cast to bf16 in-kernel (avoids a separate XLA convert pass over x in HBM).
    x = x_ref[...].astype(jnp.bfloat16)
    # Layer 1: Linear(784, 256) + ReLU   (Dropout is identity in eval mode)
    h = jnp.dot(x, w1_ref[...], preferred_element_type=jnp.float32)
    h = jnp.maximum(h + b1_ref[...], 0.0)
    # Layer 2: Linear(256, 128) + ReLU
    h = jnp.dot(h.astype(jnp.bfloat16), w2_ref[...], preferred_element_type=jnp.float32)
    h = jnp.maximum(h + b2_ref[...], 0.0)
    # Layer 3: Linear(128, 64) + ReLU
    h = jnp.dot(h.astype(jnp.bfloat16), w3_ref[...], preferred_element_type=jnp.float32)
    h = jnp.maximum(h + b3_ref[...], 0.0)
    # Layer 4: Linear(64, 128-padded) + Sigmoid; only column 0 is meaningful.
    logits = jnp.dot(h.astype(jnp.bfloat16), w4_ref[...], preferred_element_type=jnp.float32)
    o_ref[...] = jax.nn.sigmoid(logits + b4_ref[...]).astype(o_ref.dtype)


@functools.partial(jax.jit, static_argnames=("batch_tile",))
def discriminator_forward(x, params, batch_tile=1024):
    """x: any shape with leading batch dim, flattened to (B, 784) (mirrors x.view(B, 784)).

    The kernel reads x in its native f32 (or bf16) dtype and casts to bf16 on-chip.
    Ragged batches are padded only to a multiple of 64 and sliced back afterwards.
    """
    b = x.shape[0]
    x2 = x.reshape(b, INPUT_DIM)
    if x2.dtype not in (jnp.float32, jnp.bfloat16):
        x2 = x2.astype(jnp.float32)

    padded_b = _round_up(b, 64)
    if padded_b != b:
        x2 = jnp.pad(x2, ((0, padded_b - b), (0, 0)))
    tile = _choose_tile(padded_b, max(int(batch_tile), 64))

    (w1, b1), (w2, b2), (w3, b3), (w4, b4) = params
    w1b = w1.astype(jnp.bfloat16)
    w2b = w2.astype(jnp.bfloat16)
    w3b = w3.astype(jnp.bfloat16)
    b1f = b1.astype(jnp.float32)
    b2f = b2.astype(jnp.float32)
    b3f = b3.astype(jnp.float32)
    # Pad the 64 -> 1 head to 64 -> 128 (zeros) so the output store is lane-dense.
    w4p = jnp.zeros((HIDDEN[2], PADDED_OUT), jnp.bfloat16).at[:, :OUTPUT_DIM].set(
        w4.astype(jnp.bfloat16))
    b4p = jnp.zeros((1, PADDED_OUT), jnp.float32).at[:, :OUTPUT_DIM].set(
        b4.astype(jnp.float32))

    grid = (padded_b // tile,)

    x_map = lambda i: (i, 0)
    w_map = lambda i: (0, 0)  # constant index_map: weights fetched once, stay resident

    macs_per_row = (INPUT_DIM * HIDDEN[0] + HIDDEN[0] * HIDDEN[1]
                    + HIDDEN[1] * HIDDEN[2] + HIDDEN[2] * PADDED_OUT)
    weight_bytes = 2 * macs_per_row + 4 * (HIDDEN[0] + HIDDEN[1] + HIDDEN[2] + PADDED_OUT)
    cost = pl.CostEstimate(
        flops=2 * padded_b * macs_per_row,
        transcendentals=padded_b * PADDED_OUT,
        bytes_accessed=(padded_b * INPUT_DIM * x2.dtype.itemsize
                        + weight_bytes
                        + padded_b * PADDED_OUT * 2),
    )

    out = pl.pallas_call(
        _disc_kernel,
        out_shape=jax.ShapeDtypeStruct((padded_b, PADDED_OUT), jnp.bfloat16),
        grid_spec=pltpu.PrefetchScalarGridSpec(
            num_scalar_prefetch=0,
            grid=grid,
            in_specs=[
                pl.BlockSpec((tile, INPUT_DIM), x_map),
                pl.BlockSpec((INPUT_DIM, HIDDEN[0]), w_map),
                pl.BlockSpec((1, HIDDEN[0]), w_map),
                pl.BlockSpec((HIDDEN[0], HIDDEN[1]), w_map),
                pl.BlockSpec((1, HIDDEN[1]), w_map),
                pl.BlockSpec((HIDDEN[1], HIDDEN[2]), w_map),
                pl.BlockSpec((1, HIDDEN[2]), w_map),
                pl.BlockSpec((HIDDEN[2], PADDED_OUT), w_map),
                pl.BlockSpec((1, PADDED_OUT), w_map),
            ],
            out_specs=pl.BlockSpec((tile, PADDED_OUT), x_map),
        ),
        compiler_params=pltpu.CompilerParams(
            dimension_semantics=("parallel",),
            vmem_limit_bytes=32 * 1024 * 1024),
        cost_estimate=cost,
    )(x2, w1b, b1f, w2b, b2f, w3b, b3f, w4p, b4p)

    return out[:b, :OUTPUT_DIM].astype(jnp.float32)


def init_params(key):
    """Deterministic init mimicking torch.nn.Linear (uniform +/- 1/sqrt(fan_in))."""
    dims = [INPUT_DIM] + HIDDEN + [OUTPUT_DIM]
    params = []
    for i in range(len(dims) - 1):
        fan_in, fan_out = dims[i], dims[i + 1]
        key, kw, kb = jax.random.split(key, 3)
        bound = 1.0 / jnp.sqrt(jnp.float32(fan_in))
        w = jax.random.uniform(kw, (fan_in, fan_out), jnp.float32, -bound, bound)
        bias = jax.random.uniform(kb, (1, fan_out), jnp.float32, -bound, bound)
        params.append((w, bias))
    return params


def reference_forward_matched(x, params):
    """Same precision path as the kernel: bf16 matmul operands, f32 accumulate/elementwise."""
    b = x.shape[0]
    h = x.reshape(b, INPUT_DIM).astype(jnp.bfloat16)
    (w1, b1), (w2, b2), (w3, b3), (w4, b4) = params

    def lin(h, w, bias):
        return jnp.dot(h.astype(jnp.bfloat16), w.astype(jnp.bfloat16),
                       preferred_element_type=jnp.float32) + bias

    h = jnp.maximum(lin(h, w1, b1), 0.0)
    h = jnp.maximum(lin(h, w2, b2), 0.0)
    h = jnp.maximum(lin(h, w3, b3), 0.0)
    return jax.nn.sigmoid(lin(h, w4, b4))


def reference_forward_f32(x, params):
    b = x.shape[0]
    h = x.reshape(b, INPUT_DIM).astype(jnp.float32)
    (w1, b1), (w2, b2), (w3, b3), (w4, b4) = params
    h = jnp.maximum(h @ w1 + b1, 0.0)
    h = jnp.maximum(h @ w2 + b2, 0.0)
    h = jnp.maximum(h @ w3 + b3, 0.0)
    return jax.nn.sigmoid(h @ w4 + b4)


if __name__ == "__main__":
    key = jax.random.PRNGKey(0)
    key, kx1, kx2 = jax.random.split(key, 3)
    params = init_params(key)

    # MNIST-like input: (batch, 1, 28, 28); forward flattens to (batch, 784).
    batch = 8
    x = jax.random.normal(kx1, (batch, 1, 28, 28), jnp.float32)
    out = jax.block_until_ready(discriminator_forward(x, params))
    assert out.shape == (batch, OUTPUT_DIM)
    # bf16 output store loses ~3 significant digits -> tolerances loosened accordingly.
    assert jnp.allclose(out, reference_forward_matched(x, params), atol=1e-2), \
        "mismatch vs matched-precision (bf16 matmul) JAX reference"
    assert jnp.allclose(out, reference_forward_f32(x, params), atol=5e-2), \
        "mismatch vs f32 JAX reference (beyond bf16 tolerance)"

    # Ragged batch exercising 64-quantum padding + multi-step grid (200 -> 256, tile 128, grid 2).
    batch2 = 200
    x_big = jax.random.normal(kx2, (batch2, 1, 28, 28), jnp.float32)
    out2 = jax.block_until_ready(discriminator_forward(x_big, params))
    assert out2.shape == (batch2, OUTPUT_DIM)
    assert jnp.allclose(out2, reference_forward_matched(x_big, params), atol=1e-2), \
        "ragged-batch mismatch vs matched-precision JAX reference"

    print("KERNEL_OK")
</pallas_src>

<mosaic_0001>
module attributes {stable_mosaic.version = 11 : i64} {
  func.func @_disc_kernel(%arg0: i32, %arg1: memref<64x784xf32, #tpu.memory_space<vmem>>, %arg2: memref<784x256xbf16, #tpu.memory_space<vmem>>, %arg3: memref<1x256xf32, #tpu.memory_space<vmem>>, %arg4: memref<256x128xbf16, #tpu.memory_space<vmem>>, %arg5: memref<1x128xf32, #tpu.memory_space<vmem>>, %arg6: memref<128x64xbf16, #tpu.memory_space<vmem>>, %arg7: memref<1x64xf32, #tpu.memory_space<vmem>>, %arg8: memref<64x128xbf16, #tpu.memory_space<vmem>>, %arg9: memref<1x128xf32, #tpu.memory_space<vmem>>, %arg10: memref<64x128xbf16, #tpu.memory_space<vmem>>) attributes {dimension_semantics = [#tpu.dimension_semantics<parallel>], iteration_bounds = array<i64: 1>, scalar_prefetch = 0 : i64, scratch_operands = 0 : i64, tpu.core_type = #tpu.core_type<tc>, window_params = [{transform_indices = @transform_0, window_bounds = array<i64: 64, 784>}, {pipeline_mode = #tpu.pipeline_mode<synchronous>, transform_indices = @transform_1, window_bounds = array<i64: 784, 256>}, {pipeline_mode = #tpu.pipeline_mode<synchronous>, transform_indices = @transform_2, window_bounds = array<i64: 1, 256>}, {pipeline_mode = #tpu.pipeline_mode<synchronous>, transform_indices = @transform_3, window_bounds = array<i64: 256, 128>}, {pipeline_mode = #tpu.pipeline_mode<synchronous>, transform_indices = @transform_4, window_bounds = array<i64: 1, 128>}, {pipeline_mode = #tpu.pipeline_mode<synchronous>, transform_indices = @transform_5, window_bounds = array<i64: 128, 64>}, {pipeline_mode = #tpu.pipeline_mode<synchronous>, transform_indices = @transform_6, window_bounds = array<i64: 1, 64>}, {pipeline_mode = #tpu.pipeline_mode<synchronous>, transform_indices = @transform_7, window_bounds = array<i64: 64, 128>}, {pipeline_mode = #tpu.pipeline_mode<synchronous>, transform_indices = @transform_8, window_bounds = array<i64: 1, 128>}, {transform_indices = @transform_9, window_bounds = array<i64: 64, 128>}]} {
    %c0 = arith.constant 0 : index
    %c0_0 = arith.constant 0 : index
    %0 = vector.load %arg1[%c0, %c0_0] : memref<64x784xf32, #tpu.memory_space<vmem>>, vector<64x784xf32>
    %1 = arith.truncf %0 : vector<64x784xf32> to vector<64x784xbf16>
    %c0_1 = arith.constant 0 : index
    %c0_2 = arith.constant 0 : index
    %2 = vector.load %arg2[%c0_1, %c0_2] : memref<784x256xbf16, #tpu.memory_space<vmem>>, vector<784x256xbf16>
    %cst = arith.constant dense<0.000000e+00> : vector<64x256xf32>
    %3 = tpu.matmul %1, %2, %cst {dimension_numbers = #tpu.dot_dimension_numbers<[1], [0], [0], [1], [0, 0, 1, 1], [], []>} : vector<64x784xbf16>, vector<784x256xbf16>, vector<64x256xf32> -> vector<64x256xf32>
    %c0_3 = arith.constant 0 : index
    %c0_4 = arith.constant 0 : index
    %4 = vector.load %arg3[%c0_3, %c0_4] : memref<1x256xf32, #tpu.memory_space<vmem>>, vector<1x256xf32>
    %5 = vector.broadcast %4 : vector<1x256xf32> to vector<64x256xf32>
    %6 = arith.addf %3, %5 : vector<64x256xf32>
    %cst_5 = arith.constant 0.000000e+00 : f32
    %7 = vector.broadcast %cst_5 : f32 to vector<64x256xf32>
    %8 = arith.maximumf %6, %7 : vector<64x256xf32>
    %9 = arith.truncf %8 : vector<64x256xf32> to vector<64x256xbf16>
    %c0_6 = arith.constant 0 : index
    %c0_7 = arith.constant 0 : index
    %10 = vector.load %arg4[%c0_6, %c0_7] : memref<256x128xbf16, #tpu.memory_space<vmem>>, vector<256x128xbf16>
    %cst_8 = arith.constant dense<0.000000e+00> : vector<64x128xf32>
    %11 = tpu.matmul %9, %10, %cst_8 {dimension_numbers = #tpu.dot_dimension_numbers<[1], [0], [0], [1], [0, 0, 1, 1], [], []>} : vector<64x256xbf16>, vector<256x128xbf16>, vector<64x128xf32> -> vector<64x128xf32>
    %c0_9 = arith.constant 0 : index
    %c0_10 = arith.constant 0 : index
    %12 = vector.load %arg5[%c0_9, %c0_10] : memref<1x128xf32, #tpu.memory_space<vmem>>, vector<1x128xf32>
    %13 = vector.broadcast %12 : vector<1x128xf32> to vector<64x128xf32>
    %14 = arith.addf %11, %13 : vector<64x128xf32>
    %cst_11 = arith.constant 0.000000e+00 : f32
    %15 = vector.broadcast %cst_11 : f32 to vector<64x128xf32>
    %16 = arith.maximumf %14, %15 : vector<64x128xf32>
    %17 = arith.truncf %16 : vector<64x128xf32> to vector<64x128xbf16>
    %c0_12 = arith.constant 0 : index
    %c0_13 = arith.constant 0 : index
    %18 = vector.load %arg6[%c0_12, %c0_13] : memref<128x64xbf16, #tpu.memory_space<vmem>>, vector<128x64xbf16>
    %cst_14 = arith.constant dense<0.000000e+00> : vector<64x64xf32>
    %19 = tpu.matmul %17, %18, %cst_14 {dimension_numbers = #tpu.dot_dimension_numbers<[1], [0], [0], [1], [0, 0, 1, 1], [], []>} : vector<64x128xbf16>, vector<128x64xbf16>, vector<64x64xf32> -> vector<64x64xf32>
    %c0_15 = arith.constant 0 : index
    %c0_16 = arith.constant 0 : index
    %20 = vector.load %arg7[%c0_15, %c0_16] : memref<1x64xf32, #tpu.memory_space<vmem>>, vector<1x64xf32>
    %21 = vector.broadcast %20 : vector<1x64xf32> to vector<64x64xf32>
    %22 = arith.addf %19, %21 : vector<64x64xf32>
    %cst_17 = arith.constant 0.000000e+00 : f32
    %23 = vector.broadcast %cst_17 : f32 to vector<64x64xf32>
    %24 = arith.maximumf %22, %23 : vector<64x64xf32>
    %25 = arith.truncf %24 : vector<64x64xf32> to vector<64x64xbf16>
    %c0_18 = arith.constant 0 : index
    %c0_19 = arith.constant 0 : index
    %26 = vector.load %arg8[%c0_18, %c0_19] : memref<64x128xbf16, #tpu.memory_space<vmem>>, vector<64x128xbf16>
    %cst_20 = arith.constant dense<0.000000e+00> : vector<64x128xf32>
    %27 = tpu.matmul %25, %26, %cst_20 {dimension_numbers = #tpu.dot_dimension_numbers<[1], [0], [0], [1], [0, 0, 1, 1], [], []>} : vector<64x64xbf16>, vector<64x128xbf16>, vector<64x128xf32> -> vector<64x128xf32>
    %c0_21 = arith.constant 0 : index
    %c0_22 = arith.constant 0 : index
    %28 = vector.load %arg9[%c0_21, %c0_22] : memref<1x128xf32, #tpu.memory_space<vmem>>, vector<1x128xf32>
    %29 = vector.broadcast %28 : vector<1x128xf32> to vector<64x128xf32>
    %30 = arith.addf %27, %29 : vector<64x128xf32>
    %31 = arith.negf %30 : vector<64x128xf32>
    %32 = math.exp %31 : vector<64x128xf32>
    %cst_23 = arith.constant 1.000000e+00 : f32
    %33 = vector.broadcast %cst_23 : f32 to vector<64x128xf32>
    %34 = arith.addf %33, %32 : vector<64x128xf32>
    %35 = arith.divf %33, %34 : vector<64x128xf32>
    %36 = arith.truncf %35 : vector<64x128xf32> to vector<64x128xbf16>
    %c0_24 = arith.constant 0 : index
    %c0_25 = arith.constant 0 : index
    %37 = vector.load %arg10[%c0_24, %c0_25] : memref<64x128xbf16, #tpu.memory_space<vmem>>, vector<64x128xbf16>
    tpu.vector_store %arg10[%c0_24, %c0_25], %36 {strides = array<i32>} : memref<64x128xbf16, #tpu.memory_space<vmem>>, vector<64x128xbf16>,
    return
  }
  func.func @transform_0(%arg0: i32) -> (i32, i32) {
    %c0_i32 = arith.constant 0 : i32
    %c0_i32_0 = arith.constant 0 : i32
    return %arg0, %c0_i32 : i32, i32
  }
  func.func @transform_1(%arg0: i32) -> (i32, i32) {
    %c0_i32 = arith.constant 0 : i32
    %c0_i32_0 = arith.constant 0 : i32
    %c0_i32_1 = arith.constant 0 : i32
    return %c0_i32, %c0_i32_0 : i32, i32
  }
  func.func @transform_2(%arg0: i32) -> (i32, i32) {
    %c0_i32 = arith.constant 0 : i32
    %c0_i32_0 = arith.constant 0 : i32
    %c0_i32_1 = arith.constant 0 : i32
    return %c0_i32, %c0_i32_0 : i32, i32
  }
  func.func @transform_3(%arg0: i32) -> (i32, i32) {
    %c0_i32 = arith.constant 0 : i32
    %c0_i32_0 = arith.constant 0 : i32
    %c0_i32_1 = arith.constant 0 : i32
    return %c0_i32, %c0_i32_0 : i32, i32
  }
  func.func @transform_4(%arg0: i32) -> (i32, i32) {
    %c0_i32 = arith.constant 0 : i32
    %c0_i32_0 = arith.constant 0 : i32
    %c0_i32_1 = arith.constant 0 : i32
    return %c0_i32, %c0_i32_0 : i32, i32
  }
  func.func @transform_5(%arg0: i32) -> (i32, i32) {
    %c0_i32 = arith.constant 0 : i32
    %c0_i32_0 = arith.constant 0 : i32
    %c0_i32_1 = arith.constant 0 : i32
    return %c0_i32, %c0_i32_0 : i32, i32
  }
  func.func @transform_6(%arg0: i32) -> (i32, i32) {
    %c0_i32 = arith.constant 0 : i32
    %c0_i32_0 = arith.constant 0 : i32
    %c0_i32_1 = arith.constant 0 : i32
    return %c0_i32, %c0_i32_0 : i32, i32
  }
  func.func @transform_7(%arg0: i32) -> (i32, i32) {
    %c0_i32 = arith.constant 0 : i32
    %c0_i32_0 = arith.constant 0 : i32
    %c0_i32_1 = arith.constant 0 : i32
    return %c0_i32, %c0_i32_0 : i32, i32
  }
  func.func @transform_8(%arg0: i32) -> (i32, i32) {
    %c0_i32 = arith.constant 0 : i32
    %c0_i32_0 = arith.constant 0 : i32
    %c0_i32_1 = arith.constant 0 : i32
    return %c0_i32, %c0_i32_0 : i32, i32
  }
  func.func @transform_9(%arg0: i32) -> (i32, i32) {
    %c0_i32 = arith.constant 0 : i32
    %c0_i32_0 = arith.constant 0 : i32
    return %arg0, %c0_i32 : i32, i32
  }
}

</mosaic_0001>

<bundles_post_ra>
// kernel: discriminator_forward.1
= control target key start
LH: loop header
LB: loop body
LE: loop exit
PB: predicated region body
PF: predicated region fallthrough
CT: control target
= control target key end

     0   :  { %vm711_vm0 = vcmask 130048   ;;  %vm1501_vm1 = vcmask 523264   ;;  %s3653_s1 = inlined_call_operand.vmem [shape: bf16[784,256], index: 1, kind: input, shape index: {}]   ;;  %s3654_s0 = inlined_call_operand.vmem [shape: f32[64,784], index: 0, kind: input, shape index: {}]   ;;  %s3655_s2 = inlined_call_operand.vmem [shape: f32[1,256], index: 2, kind: input, shape index: {}]   ;;  %s3656_s3 = inlined_call_operand.vmem [shape: bf16[256,128], index: 3, kind: input, shape index: {}]   ;;  %s3657_s4 = inlined_call_operand.vmem [shape: f32[1,128], index: 4, kind: input, shape index: {}]   ;;  %s3658_s5 = inlined_call_operand.vmem [shape: bf16[128,64], index: 5, kind: input, shape index: {}]   ;;  %s3659_s6 = inlined_call_operand.vmem [shape: f32[1,64], index: 6, kind: input, shape index: {}]   ;;  %s3660_s7 = inlined_call_operand.vmem [shape: bf16[64,128], index: 7, kind: input, shape index: {}]   ;;  %s3661_s8 = inlined_call_operand.vmem [shape: f32[1,128], index: 8, kind: input, shape index: {}]   ;;  %s3662_s9 = inlined_call_operand.vmem [shape: bf16[64,128], index: 9, kind: output, shape index: {}]  }
   0x1   :  { %v1773_v0 = vld [vmem:[%s3653_s1 + $0x70] sm:$0xf]  ;;  %v2254_v1 = vld [vmem:[%s3653_s1 + $0x74] sm:$0xf0]  ;;  %v1765_v5 = vld [vmem:[%s3653_s1 + $0x60] sm:$0xf] }
   0x2   :  { %v1837_v2 = vld [vmem:[%s3653_s1 + $0xf0] sm:$0xf]  ;;  %v1774_v3 = vor.u32 %v2254_v1, %v1773_v0  ;;  %v2270_v4 = vld [vmem:[%s3653_s1 + $0xf4] sm:$0xf0]  ;;  %v2252_v6 = vld [vmem:[%s3653_s1 + $0x64] sm:$0xf0] }
   0x3   :  { %v1838_v7 = vor.u32 %v2270_v4, %v1837_v2  ;;  %v1829_v8 = vld [vmem:[%s3653_s1 + $0xe0] sm:$0xf]  ;;  %v2268_v9 = vld [vmem:[%s3653_s1 + $0xe4] sm:$0xf0]  ;;  %v1766_v10 = vor.u32 %v2252_v6, %v1765_v5  ;;  %v1757_v12 = vld [vmem:[%s3653_s1 + $0x50] sm:$0xf] }
   0x4   :  { %2388 = vmatpush.bf16.msra.mxu2 %v1774_v3  ;;  %724 = vmatpush.bf16.msra.mxu0 %v1774_v3  ;;  %v1830_v11 = vor.u32 %v2268_v9, %v1829_v8  ;;  %v2250_v13 = vld [vmem:[%s3653_s1 + $0x54] sm:$0xf0]  ;;  %v1821_v14 = vld [vmem:[%s3653_s1 + $0xd0] sm:$0xf]  ;;  %v1749_v18 = vld [vmem:[%s3653_s1 + $0x40] sm:$0xf] }
   0x5   :  { %2396 = vmatpush.bf16.msra.mxu3 %v1838_v7  ;;  %753 = vmatpush.bf16.msra.mxu1 %v1838_v7  ;;  %v2266_v15 = vld [vmem:[%s3653_s1 + $0xd4] sm:$0xf0]  ;;  %v1758_v16 = vor.u32 %v2250_v13, %v1757_v12  ;;  %v2248_v19 = vld [vmem:[%s3653_s1 + $0x44] sm:$0xf0]  ;;  %v1813_v20 = vld [vmem:[%s3653_s1 + $0xc0] sm:$0xf] }
   0x6   :  { %v1822_v17 = vor.u32 %v2266_v15, %v1821_v14  ;;  %v2264_v21 = vld [vmem:[%s3653_s1 + $0xc4] sm:$0xf0]  ;;  %v1750_v22 = vor.u32 %v2248_v19, %v1749_v18  ;;  %v1741_v24 = vld [vmem:[%s3653_s1 + $0x30] sm:$0xf]  ;;  %v2246_v25 = vld [vmem:[%s3653_s1 + $0x34] sm:$0xf0] }
   0x7   :  { %v1814_v23 = vor.u32 %v2264_v21, %v1813_v20  ;;  %v1805_v26 = vld [vmem:[%s3653_s1 + $0xb0] sm:$0xf]  ;;  %v2262_v27 = vld [vmem:[%s3653_s1 + $0xb4] sm:$0xf0]  ;;  %v1742_v28 = vor.u32 %v2246_v25, %v1741_v24  ;;  %v1733_v30 = vld [vmem:[%s3653_s1 + $0x20] sm:$0xf] }
   0x8   :  { %2389 = vmatpush.bf16.msra.mxu2 %v1766_v10  ;;  %725 = vmatpush.bf16.msra.mxu0 %v1766_v10  ;;  %v1806_v29 = vor.u32 %v2262_v27, %v1805_v26  ;;  %v2244_v31 = vld [vmem:[%s3653_s1 + $0x24] sm:$0xf0]  ;;  %v1797_v32 = vld [vmem:[%s3653_s1 + $0xa0] sm:$0xf]  ;;  %v1725_v36 = vld [vmem:[%s3653_s1 + $0x10] sm:$0xf] }
   0x9   :  { %2397 = vmatpush.bf16.msra.mxu3 %v1830_v11  ;;  %754 = vmatpush.bf16.msra.mxu1 %v1830_v11  ;;  %v2260_v33 = vld [vmem:[%s3653_s1 + $0xa4] sm:$0xf0]  ;;  %v1734_v34 = vor.u32 %v2244_v31, %v1733_v30  ;;  %v2242_v37 = vld [vmem:[%s3653_s1 + $0x14] sm:$0xf0]  ;;  %v1789_v38 = vld [vmem:[%s3653_s1 + $0x90] sm:$0xf] }
   0xa   :  { %v1798_v35 = vor.u32 %v2260_v33, %v1797_v32  ;;  %v2258_v39 = vld [vmem:[%s3653_s1 + $0x94] sm:$0xf0]  ;;  %v1726_v40 = vor.u32 %v2242_v37, %v1725_v36  ;;  %v1717_v41 = vld [vmem:[%s3653_s1] sm:$0xf]  ;;  %v2240_v43 = vld [vmem:[%s3653_s1 + $0x4] sm:$0xf0] }
   0xb   :  { %v1790_v42 = vor.u32 %v2258_v39, %v1789_v38  ;;  %v1781_v44 = vld [vmem:[%s3653_s1 + $0x80] sm:$0xf]  ;;  %v2256_v45 = vld [vmem:[%s3653_s1 + $0x84] sm:$0xf0]  ;;  %v68_v47 = vld [vmem:[%s3654_s0 + $0x118] sm:$0xff]  ;;  %v1718_v54 = vor.u32 %v2240_v43, %v1717_v41 }
   0xc   :  { %2390 = vmatpush.bf16.msra.mxu2 %v1758_v16  ;;  %726 = vmatpush.bf16.msra.mxu0 %v1758_v16  ;;  %v61_v46 = vld [vmem:[%s3654_s0 + $0xe0] sm:$0xff]  ;;  %v1901_v48 = vld [vmem:[%s3653_s1 + $0x170] sm:$0xf]  ;;  %v2286_v49 = vld [vmem:[%s3653_s1 + $0x174] sm:$0xf0]  ;;  %v1782_v58 = vor.u32 %v2256_v45, %v1781_v44 }
   0xd   :  { %2398 = vmatpush.bf16.msra.mxu3 %v1822_v17  ;;  %755 = vmatpush.bf16.msra.mxu1 %v1822_v17  ;;  %v62_v50 = vld [vmem:[%s3654_s0 + $0xe8] sm:$0xff]  ;;  %v69_v51 = vld [vmem:[%s3654_s0 + $0x120] sm:$0xff]  ;;  %v1965_v52 = vld [vmem:[%s3653_s1 + $0x1f0] sm:$0xf]  ;;  %v1902_v59 = vor.u32 %v2286_v49, %v1901_v48  ;;  %v2636_v3 = vpack.c.bf16 %v68_v47, %v61_v46 }
   0xe   :  { %v2302_v53 = vld [vmem:[%s3653_s1 + $0x1f4] sm:$0xf0]  ;;  %v33_v55 = vld [vmem:[%s3654_s0] sm:$0xff]  ;;  %v2029_v57 = vld [vmem:[%s3653_s1 + $0x270] sm:$0xf]  ;;  %v2649_v8 = vpack.c.bf16 %v69_v51, %v62_v50 }
   0xf   :  { %v40_v56 = vld [vmem:[%s3654_s0 + $0x38] sm:$0xff]  ;;  %v34_v61 = vld [vmem:[%s3654_s0 + $0x8] sm:$0xff]  ;;  %v41_v62 = vld [vmem:[%s3654_s0 + $0x40] sm:$0xff]  ;;  %v1966_v63 = vor.u32 %v2302_v53, %v1965_v52 }
  0x10   :  { %2391 = vmatpush.bf16.msra.mxu2 %v1750_v22  ;;  %727 = vmatpush.bf16.msra.mxu0 %v1750_v22  ;;  %v2318_v60 = vld [vmem:[%s3653_s1 + $0x274] sm:$0xf0]  ;;  %v1893_v0 = vld [vmem:[%s3653_s1 + $0x160] sm:$0xf]  ;;  %v2284_v1 = vld [vmem:[%s3653_s1 + $0x164] sm:$0xf0]  ;;  %v2638_v4 = vpack.c.bf16 %v40_v56, %v33_v55  ;;  %v2651_v10 = vpack.c.bf16 %v41_v62, %v34_v61 }
  0x11   :  { %2399 = vmatpush.bf16.msra.mxu3 %v1814_v23  ;;  %756 = vmatpush.bf16.msra.mxu1 %v1814_v23  ;;  %v1957_v2 = vld [vmem:[%s3653_s1 + $0x1e0] sm:$0xf]  ;;  %v2300_v5 = vld [vmem:[%s3653_s1 + $0x1e4] sm:$0xf0]  ;;  %v2093_v6 = vld [vmem:[%s3653_s1 + $0x2f0] sm:$0xf]  ;;  %v2030_v9 = vor.u32 %v2318_v60, %v2029_v57  ;;  %v1894_v11 = vor.u32 %v2284_v1, %v1893_v0 }
  0x12   :  { %v2334_v7 = vld [vmem:[%s3653_s1 + $0x2f4] sm:$0xf0]  ;;  %v2021_v12 = vld [vmem:[%s3653_s1 + $0x260] sm:$0xf]  ;;  %v2316_v13 = vld [vmem:[%s3653_s1 + $0x264] sm:$0xf0]  ;;  %v1958_v14 = vor.u32 %v2300_v5, %v1957_v2 }
  0x13   :  { %v2094_v15 = vor.u32 %v2334_v7, %v2093_v6  ;;  %v1885_v16 = vld [vmem:[%s3653_s1 + $0x150] sm:$0xf]  ;;  %v2282_v17 = vld [vmem:[%s3653_s1 + $0x154] sm:$0xf0]  ;;  %v2085_v20 = vld [vmem:[%s3653_s1 + $0x2e0] sm:$0xf]  ;;  %v2022_v22 = vor.u32 %v2316_v13, %v2021_v12 }
  0x14   :  { %2392 = vmatpush.bf16.msra.mxu2 %v1742_v28  ;;  %728 = vmatpush.bf16.msra.mxu0 %v1742_v28  ;;  %v1949_v18 = vld [vmem:[%s3653_s1 + $0x1d0] sm:$0xf]  ;;  %v2298_v19 = vld [vmem:[%s3653_s1 + $0x1d4] sm:$0xf0]  ;;  %v2332_v21 = vld [vmem:[%s3653_s1 + $0x2e4] sm:$0xf0]  ;;  %v1886_v23 = vor.u32 %v2282_v17, %v1885_v16 }
  0x15   :  { %2400 = vmatpush.bf16.msra.mxu3 %v1806_v29  ;;  %757 = vmatpush.bf16.msra.mxu1 %v1806_v29  ;;  %v2013_v24 = vld [vmem:[%s3653_s1 + $0x250] sm:$0xf]  ;;  %v2314_v25 = vld [vmem:[%s3653_s1 + $0x254] sm:$0xf0]  ;;  %v1950_v26 = vor.u32 %v2298_v19, %v1949_v18  ;;  %v2086_v27 = vor.u32 %v2332_v21, %v2085_v20  ;;  %v1877_v28 = vld [vmem:[%s3653_s1 + $0x140] sm:$0xf] }
  0x16   :  { %v2280_v29 = vld [vmem:[%s3653_s1 + $0x144] sm:$0xf0]  ;;  %v1941_v30 = vld [vmem:[%s3653_s1 + $0x1c0] sm:$0xf]  ;;  %v2077_v32 = vld [vmem:[%s3653_s1 + $0x2d0] sm:$0xf] }
  0x17   :  { %v2296_v31 = vld [vmem:[%s3653_s1 + $0x1c4] sm:$0xf0]  ;;  %v2330_v33 = vld [vmem:[%s3653_s1 + $0x2d4] sm:$0xf0]  ;;  %v2005_v36 = vld [vmem:[%s3653_s1 + $0x240] sm:$0xf] }
  0x18   :  { %2393 = vmatpush.bf16.msra.mxu2 %v1734_v34  ;;  %729 = vmatpush.bf16.msra.mxu0 %v1734_v34  ;;  %v2014_v34 = vor.u32 %v2314_v25, %v2013_v24  ;;  %v2312_v37 = vld [vmem:[%s3653_s1 + $0x244] sm:$0xf0]  ;;  %v1942_v38 = vor.u32 %v2296_v31, %v1941_v30  ;;  %v2078_v39 = vor.u32 %v2330_v33, %v2077_v32  ;;  %v2278_v43 = vld [vmem:[%s3653_s1 + $0x134] sm:$0xf0]  ;;  %v1933_v44 = vld [vmem:[%s3653_s1 + $0x1b0] sm:$0xf] }
  0x19   :  { %2401 = vmatpush.bf16.msra.mxu3 %v1798_v35  ;;  %758 = vmatpush.bf16.msra.mxu1 %v1798_v35  ;;  %v1878_v35 = vor.u32 %v2280_v29, %v1877_v28  ;;  %v82_v41 = vld [vmem:[%s3654_s0 + $0x188] sm:$0xff]  ;;  %v76_v45 = vld [vmem:[%s3654_s0 + $0x158] sm:$0xff]  ;;  %v83_v46 = vld [vmem:[%s3654_s0 + $0x190] sm:$0xff]  ;;  %v2006_v50 = vor.u32 %v2312_v37, %v2005_v36 }
  0x1a   :  { %v2294_v47 = vld [vmem:[%s3653_s1 + $0x1b4] sm:$0xf0]  ;;  %v2069_v48 = vld [vmem:[%s3653_s1 + $0x2c0] sm:$0xf]  ;;  %v2328_v49 = vld [vmem:[%s3653_s1 + $0x2c4] sm:$0xf0]  ;;  %v2781_v6 = vpack.c.bf16 %v83_v46, %v76_v45 }
  0x1b   :  { %v47_v51 = vld [vmem:[%s3654_s0 + $0x70] sm:$0xff]  ;;  %v54_v52 = vld [vmem:[%s3654_s0 + $0xa8] sm:$0xff]  ;;  %v2310_v55 = vld [vmem:[%s3653_s1 + $0x234] sm:$0xf0] }
  0x1c   :  { %2394 = vmatpush.bf16.msra.mxu2 %v1726_v40  ;;  %730 = vmatpush.bf16.msra.mxu0 %v1726_v40  ;;  %v75_v40 = vld [vmem:[%s3654_s0 + $0x150] sm:$0xff]  ;;  %v48_v56 = vld [vmem:[%s3654_s0 + $0x78] sm:$0xff]  ;;  %v1861_v60 = vld [vmem:[%s3653_s1 + $0x120] sm:$0xf]  ;;  %v2770_v0 = vpack.c.bf16 %v54_v52, %v47_v51 }
  0x1d   :  { %2402 = vmatpush.bf16.msra.mxu3 %v1790_v42  ;;  %759 = vmatpush.bf16.msra.mxu1 %v1790_v42  ;;  %v1869_v42 = vld [vmem:[%s3653_s1 + $0x130] sm:$0xf]  ;;  %v2276_v61 = vld [vmem:[%s3653_s1 + $0x124] sm:$0xf0]  ;;  %v1925_v62 = vld [vmem:[%s3653_s1 + $0x1a0] sm:$0xf] }
  0x1e   :  { %v1997_v53 = vld [vmem:[%s3653_s1 + $0x230] sm:$0xf]  ;;  %v2292_v1 = vld [vmem:[%s3653_s1 + $0x1a4] sm:$0xf0]  ;;  %v2326_v5 = vld [vmem:[%s3653_s1 + $0x2b4] sm:$0xf0] }
  0x1f   :  { %v55_v57 = vld [vmem:[%s3654_s0 + $0xb0] sm:$0xff]  ;;  %v1998_v7 = vor.u32 %v2310_v55, %v1997_v53  ;;  %v1989_v12 = vld [vmem:[%s3653_s1 + $0x220] sm:$0xf]  ;;  %v2308_v13 = vld [vmem:[%s3653_s1 + $0x224] sm:$0xf0] }
  0x20   :  { %2395 = vmatpush.bf16.msra.mxu2 %v1718_v54  ;;  %731 = vmatpush.bf16.msra.mxu0 %v1718_v54  ;;  %v1870_v54 = vor.u32 %v2278_v43, %v1869_v42  ;;  %v2061_v2 = vld [vmem:[%s3653_s1 + $0x2b0] sm:$0xf]  ;;  %v2274_v17 = vld [vmem:[%s3653_s1 + $0x114] sm:$0xf0]  ;;  %v2053_v20 = vld [vmem:[%s3653_s1 + $0x2a0] sm:$0xf] }
  0x21   :  { %2403 = vmatpush.bf16.msra.mxu3 %v1782_v58  ;;  %760 = vmatpush.bf16.msra.mxu1 %v1782_v58  ;;  %v1934_v58 = vor.u32 %v2294_v47, %v1933_v44  ;;  %v1853_v16 = vld [vmem:[%s3653_s1 + $0x110] sm:$0xf]  ;;  %v2290_v19 = vld [vmem:[%s3653_s1 + $0x194] sm:$0xf0]  ;;  %v2324_v21 = vld [vmem:[%s3653_s1 + $0x2a4] sm:$0xf0] }
  0x22   :  { %v1917_v18 = vld [vmem:[%s3653_s1 + $0x190] sm:$0xf]  ;;  %v2306_v25 = vld [vmem:[%s3653_s1 + $0x214] sm:$0xf0]  ;;  %v2054_v28 = vor.u32 %v2324_v21, %v2053_v20  ;;  %v2272_v29 = vld [vmem:[%s3653_s1 + $0x104] sm:$0xf0] }
  0x23   :  { %742 = vmatmul.bf16.vlgmr.msra.gmra.mxu2 %v2636_v3  ;;  %732 = vmatmul.bf16.vlgmr.msra.gmra.mxu0 %v2638_v4  ;;  %v1981_v24 = vld [vmem:[%s3653_s1 + $0x210] sm:$0xf]  ;;  %v1909_v30 = vld [vmem:[%s3653_s1 + $0x180] sm:$0xf]  ;;  %v2288_v31 = vld [vmem:[%s3653_s1 + $0x184] sm:$0xf0] }
  0x24   :  { %782 = vmatpush.bf16.msrb.mxu2 %v1902_v59  ;;  %771 = vmatmul.bf16.vlgmr.msra.gmra.mxu3 %v2649_v8  ;;  %v2070_v59 = vor.u32 %v2328_v49, %v2069_v48  ;;  %v2045_v32 = vld [vmem:[%s3653_s1 + $0x290] sm:$0xf]  ;;  %v2322_v33 = vld [vmem:[%s3653_s1 + $0x294] sm:$0xf0]  ;;  %v2336_v36 = vld [vmem:[%s3653_s1 + $0x304] sm:$0xf0]  ;;  %v1910_v42 = vor.u32 %v2288_v31, %v1909_v30 }
  0x25   :  { %811 = vmatpush.bf16.msrb.mxu3 %v1966_v63  ;;  %840 = vmatpush.bf16.msrb.mxu0 %v2030_v9  ;;  %v2768_v63 = vpack.c.bf16 %v82_v41, %v75_v40  ;;  %v2783_v9 = vpack.c.bf16 %v55_v57, %v48_v56  ;;  %v2253_v37 = vld [vmem:[%s3653_s1 + $0x74] sm:$0xf]  ;;  %v1973_v40 = vld [vmem:[%s3653_s1 + $0x200] sm:$0xf]  ;;  %v2304_v41 = vld [vmem:[%s3653_s1 + $0x204] sm:$0xf0]  ;;  %v2046_v43 = vor.u32 %v2322_v33, %v2045_v32 }
  0x26   :  { %761 = vmatmul.bf16.vlgmr.msra.gmra.mxu1 %v2651_v10  ;;  %v35_v44 = vld [vmem:[%s3654_s0 + $0x10] sm:$0xff]  ;;  %v42_v45 = vld [vmem:[%s3654_s0 + $0x48] sm:$0xff]  ;;  %v1839_v47 = vld [vmem:[%s3653_s1 + $0xf8] sm:$0xf0]  ;;  %v1974_v53 = vor.u32 %v2304_v41, %v1973_v40 }
  0x27   :  { %869 = vmatpush.bf16.msrb.mxu1 %v2094_v15  ;;  %v2062_v15 = vor.u32 %v2326_v5, %v2061_v2  ;;  %v2269_v46 = vld [vmem:[%s3653_s1 + $0xf4] sm:$0xf]  ;;  %v36_v48 = vld [vmem:[%s3654_s0 + $0x18] sm:$0xff]  ;;  %v2320_v51 = vld [vmem:[%s3653_s1 + $0x284] sm:$0xf0]  ;;  %v2903_v5 = vpack.c.bf16 %v42_v45, %v35_v44 }
  0x28   :  { %783 = vmatpush.bf16.msrb.mxu2 %v1894_v11  ;;  %v1862_v11 = vor.u32 %v2276_v61, %v1861_v60  ;;  %v37_v55 = vld [vmem:[%s3654_s0 + $0x20] sm:$0xff]  ;;  %v44_v56 = vld [vmem:[%s3654_s0 + $0x58] sm:$0xff]  ;;  %v38_v57 = vld [vmem:[%s3654_s0 + $0x28] sm:$0xff] }
  0x29   :  { %812 = vmatpush.bf16.msrb.mxu3 %v1958_v14  ;;  %841 = vmatpush.bf16.msrb.mxu0 %v2022_v22  ;;  %v1926_v14 = vor.u32 %v2292_v1, %v1925_v62  ;;  %v1990_v22 = vor.u32 %v2308_v13, %v1989_v12  ;;  %v1903_v60 = vld [vmem:[%s3653_s1 + $0x178] sm:$0xf0]  ;;  %v45_v62 = vld [vmem:[%s3654_s0 + $0x60] sm:$0xff]  ;;  %v1767_v2 = vld [vmem:[%s3653_s1 + $0x68] sm:$0xf0] }
  0x2a   :  { %v2251_v1 = vld [vmem:[%s3653_s1 + $0x64] sm:$0xf]  ;;  %v1831_v12 = vld [vmem:[%s3653_s1 + $0xe8] sm:$0xf0]  ;;  %v1759_v20 = vld [vmem:[%s3653_s1 + $0x58] sm:$0xf0] }
  0x2b   :  { %870 = vmatpush.bf16.msrb.mxu1 %v2086_v27  ;;  %v1918_v27 = vor.u32 %v2290_v19, %v1917_v18  ;;  %v1895_v18 = vld [vmem:[%s3653_s1 + $0x168] sm:$0xf0]  ;;  %v2249_v19 = vld [vmem:[%s3653_s1 + $0x54] sm:$0xf]  ;;  %v2263_v31 = vld [vmem:[%s3653_s1 + $0xc4] sm:$0xf] }
  0x2c   :  { %784 = vmatpush.bf16.msrb.mxu2 %v1886_v23  ;;  %v1854_v23 = vor.u32 %v2274_v17, %v1853_v16  ;;  %v1770_v16 = vor.u32 %v2251_v1, %v1767_v2  ;;  %v2283_v17 = vld [vmem:[%s3653_s1 + $0x164] sm:$0xf]  ;;  %v1815_v32 = vld [vmem:[%s3653_s1 + $0xc8] sm:$0xf0]  ;;  %v1743_v40 = vld [vmem:[%s3653_s1 + $0x38] sm:$0xf0] }
  0x2d   :  { %813 = vmatpush.bf16.msrb.mxu3 %v1950_v26  ;;  %842 = vmatpush.bf16.msrb.mxu0 %v2014_v34  ;;  %v1845_v26 = vld [vmem:[%s3653_s1 + $0x100] sm:$0xf]  ;;  %v1818_v41 = vor.u32 %v2263_v31, %v1815_v32  ;;  %v1807_v44 = vld [vmem:[%s3653_s1 + $0xb8] sm:$0xf0]  ;;  %v2241_v1 = vld [vmem:[%s3653_s1 + $0x14] sm:$0xf] }
  0x2e   :  { %v2101_v34 = vld [vmem:[%s3653_s1 + $0x300] sm:$0xf]  ;;  %v1727_v2 = vld [vmem:[%s3653_s1 + $0x18] sm:$0xf0]  ;;  %v63_v31 = vld [vmem:[%s3654_s0 + $0xf0] sm:$0xff] }
  0x2f   :  { %871 = vmatpush.bf16.msrb.mxu1 %v2078_v39  ;;  %v1846_v39 = vor.u32 %v2272_v29, %v1845_v26  ;;  %v2102_v49 = vor.u32 %v2336_v36, %v2101_v34  ;;  %v2281_v26 = vld [vmem:[%s3653_s1 + $0x154] sm:$0xf]  ;;  %v1751_v29 = vld [vmem:[%s3653_s1 + $0x48] sm:$0xf0]  ;;  %v57_v45 = vld [vmem:[%s3654_s0 + $0xc0] sm:$0xff] }
  0x30   :  { %785 = vmatpush.bf16.msrb.mxu2 %v1878_v35  ;;  %v1982_v35 = vor.u32 %v2306_v25, %v1981_v24  ;;  %v1898_v24 = vor.u32 %v2283_v17, %v1895_v18  ;;  %v1762_v25 = vor.u32 %v2249_v19, %v1759_v20  ;;  %v1879_v36 = vld [vmem:[%s3653_s1 + $0x148] sm:$0xf0]  ;;  %v2275_v17 = vld [vmem:[%s3653_s1 + $0x124] sm:$0xf] }
  0x31   :  { %814 = vmatpush.bf16.msrb.mxu3 %v1942_v38  ;;  %843 = vmatpush.bf16.msrb.mxu0 %v2006_v50  ;;  %v1775_v38 = vld [vmem:[%s3653_s1 + $0x78] sm:$0xf0]  ;;  %v2037_v50 = vld [vmem:[%s3653_s1 + $0x280] sm:$0xf]  ;;  %v1863_v18 = vld [vmem:[%s3653_s1 + $0x128] sm:$0xf0] }
  0x32   :  { %v1778_v52 = vor.u32 %v2253_v37, %v1775_v38  ;;  %v2038_v61 = vor.u32 %v2320_v51, %v2037_v50  ;;  %v49_v37 = vld [vmem:[%s3654_s0 + $0x80] sm:$0xff]  ;;  %v56_v38 = vld [vmem:[%s3654_s0 + $0xb8] sm:$0xff]  ;;  %v2277_v51 = vld [vmem:[%s3653_s1 + $0x134] sm:$0xf]  ;;  %v1866_v20 = vor.u32 %v2275_v17, %v1863_v18 }
  0x33   :  { %872 = vmatpush.bf16.msrb.mxu1 %v2070_v59  ;;  %747 = vmatmul.bf16.gmra.mxu2 %v2768_v63  ;;  %v2285_v59 = vld [vmem:[%s3653_s1 + $0x174] sm:$0xf]  ;;  %v2239_v19 = vld [vmem:[%s3653_s1 + $0x4] sm:$0xf]  ;;  %v70_v32 = vld [vmem:[%s3654_s0 + $0x128] sm:$0xff] }
  0x34   :  { %786 = vmatpush.bf16.msrb.mxu2 %v1870_v54  ;;  %737 = vmatmul.bf16.gmra.mxu0 %v2770_v0  ;;  %v43_v54 = vld [vmem:[%s3654_s0 + $0x50] sm:$0xff]  ;;  %v77_v17 = vld [vmem:[%s3654_s0 + $0x160] sm:$0xff]  ;;  %v84_v18 = vld [vmem:[%s3654_s0 + $0x198] sm:$0xff] }
  0x35   :  { %815 = vmatpush.bf16.msrb.mxu3 %v1934_v58  ;;  %844 = vmatpush.bf16.msrb.mxu0 %v1998_v7  ;;  %v1842_v58 = vor.u32 %v2269_v46, %v1839_v47  ;;  %v2905_v7 = vpack.c.bf16 %v44_v56, %v37_v55  ;;  %v2913_v13 = vpack.c.bf16 %v43_v54, %v36_v48  ;;  %v51_v46 = vld [vmem:[%s3654_s0 + $0x90] sm:$0xff]  ;;  %v58_v47 = vld [vmem:[%s3654_s0 + $0xc8] sm:$0xff]  ;;  %v2243_v54 = vld [vmem:[%s3653_s1 + $0x24] sm:$0xf] }
  0x36   :  { %776 = vmatmul.bf16.gmra.mxu3 %v2781_v6  ;;  %766 = vmatmul.bf16.gmra.mxu1 %v2783_v9  ;;  %v1735_v55 = vld [vmem:[%s3653_s1 + $0x28] sm:$0xf0] }
  0x37   :  { %873 = vmatpush.bf16.msrb.mxu1 %v2062_v15  ;;  %v2915_v15 = vpack.c.bf16 %v45_v62, %v38_v57  ;;  %v3011_v57 = vpack.c.bf16 %v56_v38, %v49_v37  ;;  %v1738_v62 = vor.u32 %v2243_v54, %v1735_v55  ;;  %v71_v37 = vld [vmem:[%s3654_s0 + $0x130] sm:$0xff]  ;;  %v66_v38 = vld [vmem:[%s3654_s0 + $0x108] sm:$0xff]  ;;  %v2315_v55 = vld [vmem:[%s3653_s1 + $0x264] sm:$0xf] }
  0x38   :  { %787 = vmatpush.bf16.msrb.mxu2 %v1862_v11  ;;  %v2267_v11 = vld [vmem:[%s3653_s1 + $0xe4] sm:$0xf] }
  0x39   :  { %816 = vmatpush.bf16.msrb.mxu3 %v1926_v14  ;;  %845 = vmatpush.bf16.msrb.mxu0 %v1990_v22  ;;  %v1906_v14 = vor.u32 %v2285_v59, %v1903_v60  ;;  %v1834_v21 = vor.u32 %v2267_v11, %v1831_v12  ;;  %v2265_v22 = vld [vmem:[%s3653_s1 + $0xd4] sm:$0xf]  ;;  %v2259_v11 = vld [vmem:[%s3653_s1 + $0xa4] sm:$0xf]  ;;  %v1730_v12 = vor.u32 %v2241_v1, %v1727_v2  ;;  %v2095_v1 = vld [vmem:[%s3653_s1 + $0x2f8] sm:$0xf0] }
  0x3a   :  { %v2335_v2 = vld [vmem:[%s3653_s1 + $0x304] sm:$0xf] }
  0x3b   :  { %874 = vmatpush.bf16.msrb.mxu1 %v2054_v28  ;;  %v2247_v28 = vld [vmem:[%s3653_s1 + $0x44] sm:$0xf] }
  0x3c   :  { %788 = vmatpush.bf16.msrb.mxu2 %v1854_v23  ;;  %v1823_v23 = vld [vmem:[%s3653_s1 + $0xd8] sm:$0xf0]  ;;  %v1754_v34 = vor.u32 %v2247_v28, %v1751_v29  ;;  %v2255_v29 = vld [vmem:[%s3653_s1 + $0x84] sm:$0xf] }
  0x3d   :  { %817 = vmatpush.bf16.msrb.mxu3 %v1918_v27  ;;  %846 = vmatpush.bf16.msrb.mxu0 %v1982_v35  ;;  %v1887_v27 = vld [vmem:[%s3653_s1 + $0x158] sm:$0xf0]  ;;  %v1826_v30 = vor.u32 %v2265_v22, %v1823_v23  ;;  %v2279_v35 = vld [vmem:[%s3653_s1 + $0x144] sm:$0xf]  ;;  %v2257_v22 = vld [vmem:[%s3653_s1 + $0x94] sm:$0xf] }
  0x3e   :  { %v1890_v33 = vor.u32 %v2281_v26, %v1887_v27  ;;  %v1882_v48 = vor.u32 %v2279_v35, %v1879_v36  ;;  %v1791_v23 = vld [vmem:[%s3653_s1 + $0x98] sm:$0xf0] }
  0x3f   :  { %875 = vmatpush.bf16.msrb.mxu1 %v2046_v43  ;;  %v2261_v43 = vld [vmem:[%s3653_s1 + $0xb4] sm:$0xf]  ;;  %v1855_v26 = vld [vmem:[%s3653_s1 + $0x118] sm:$0xf0] }
  0x40   :  { %789 = vmatpush.bf16.msrb.mxu2 %v1846_v39  ;;  %v2245_v39 = vld [vmem:[%s3653_s1 + $0x34] sm:$0xf]  ;;  %v1810_v56 = vor.u32 %v2261_v43, %v1807_v44  ;;  %v64_v36 = vld [vmem:[%s3654_s0 + $0xf8] sm:$0xff]  ;;  %v2271_v44 = vld [vmem:[%s3653_s1 + $0x104] sm:$0xf] }
  0x41   :  { %818 = vmatpush.bf16.msrb.mxu3 %v1910_v42  ;;  %847 = vmatpush.bf16.msrb.mxu0 %v1974_v53  ;;  %v50_v42 = vld [vmem:[%s3654_s0 + $0x88] sm:$0xff]  ;;  %v1746_v50 = vor.u32 %v2245_v39, %v1743_v40  ;;  %v59_v53 = vld [vmem:[%s3654_s0 + $0xd0] sm:$0xff]  ;;  %v73_v39 = vld [vmem:[%s3654_s0 + $0x140] sm:$0xff]  ;;  %v3089_v40 = vpack.c.bf16 %v70_v32, %v63_v31 }
  0x42   :  { %v3015_v59 = vpack.c.bf16 %v57_v45, %v50_v42  ;;  %v3093_v42 = vpack.c.bf16 %v71_v37, %v64_v36  ;;  %v3095_v43 = vpack.c.bf16 %v73_v39, %v66_v38  ;;  %v1847_v45 = vld [vmem:[%s3653_s1 + $0x108] sm:$0xf0]  ;;  %v2313_v31 = vld [vmem:[%s3653_s1 + $0x254] sm:$0xf]  ;;  %v2295_v38 = vld [vmem:[%s3653_s1 + $0x1c4] sm:$0xf] }
  0x43   :  { %876 = vmatpush.bf16.msrb.mxu1 %v2038_v61  ;;  %790 = vmatmul.bf16.vlgmr.msrb.gmra.mxu2 %v2903_v5  ;;  %v1943_v39 = vld [vmem:[%s3653_s1 + $0x1c8] sm:$0xf0] }
  0x44   :  { %905 = vmatpush.bf16.msra.mxu2 %v2102_v49  ;;  %848 = vmatmul.bf16.vlgmr.msrb.gmra.mxu0 %v2905_v7  ;;  %v52_v49 = vld [vmem:[%s3654_s0 + $0x98] sm:$0xff] }
  0x45   :  { %927 = vmatpush.bf16.msra.mxu3 %v1778_v52  ;;  %956 = vmatpush.bf16.msra.mxu0 %v1842_v58  ;;  %v1871_v52 = vld [vmem:[%s3653_s1 + $0x138] sm:$0xf0]  ;;  %v3013_v58 = vpack.c.bf16 %v58_v47, %v51_v46  ;;  %v3017_v61 = vpack.c.bf16 %v59_v53, %v52_v49  ;;  %v1850_v46 = vor.u32 %v2271_v44, %v1847_v45  ;;  %v2301_v47 = vld [vmem:[%s3653_s1 + $0x1f4] sm:$0xf]  ;;  %v1959_v53 = vld [vmem:[%s3653_s1 + $0x1e8] sm:$0xf0] }
  0x46   :  { %819 = vmatmul.bf16.vlgmr.msrb.gmra.mxu3 %v2913_v13  ;;  %877 = vmatmul.bf16.vlgmr.msrb.gmra.mxu1 %v2915_v15  ;;  %v1874_v60 = vor.u32 %v2277_v51, %v1871_v52  ;;  %v2317_v49 = vld [vmem:[%s3653_s1 + $0x274] sm:$0xf]  ;;  %v2031_v51 = vld [vmem:[%s3653_s1 + $0x278] sm:$0xf0]  ;;  %v2299_v52 = vld [vmem:[%s3653_s1 + $0x1e4] sm:$0xf]  ;;  %v1946_v45 = vor.u32 %v2295_v38, %v1943_v39 }
  0x47   :  { %985 = vmatpush.bf16.msra.mxu1 %v1906_v14  ;;  %v1799_v14 = vld [vmem:[%s3653_s1 + $0xa8] sm:$0xf0]  ;;  %v2034_v54 = vor.u32 %v2317_v49, %v2031_v51  ;;  %v2311_v44 = vld [vmem:[%s3653_s1 + $0x244] sm:$0xf]  ;;  %v39_v51 = vld [vmem:[%s3654_s0 + $0x30] sm:$0xff] }
  0x48   :  { %v2303_v38 = vld [vmem:[%s3653_s1 + $0x204] sm:$0xf]  ;;  %v1975_v39 = vld [vmem:[%s3653_s1 + $0x208] sm:$0xf0] }
  0x49   :  { %928 = vmatpush.bf16.msra.mxu3 %v1770_v16  ;;  %957 = vmatpush.bf16.msra.mxu0 %v1834_v21  ;;  %v1802_v16 = vor.u32 %v2259_v11, %v1799_v14  ;;  %v1719_v21 = vld [vmem:[%s3653_s1 + $0x8] sm:$0xf0] }
  0x4a   :  { %v1722_v27 = vor.u32 %v2239_v19, %v1719_v21  ;;  %v2103_v11 = vld [vmem:[%s3653_s1 + $0x308] sm:$0xf0]  ;;  %v79_v19 = vld [vmem:[%s3654_s0 + $0x170] sm:$0xff] }
  0x4b   :  { %986 = vmatpush.bf16.msra.mxu1 %v1898_v24  ;;  %v1794_v24 = vor.u32 %v2257_v22, %v1791_v23  ;;  %v78_v21 = vld [vmem:[%s3654_s0 + $0x168] sm:$0xff]  ;;  %v85_v22 = vld [vmem:[%s3654_s0 + $0x1a0] sm:$0xff]  ;;  %v80_v23 = vld [vmem:[%s3654_s0 + $0x178] sm:$0xff] }
  0x4d   :  { %929 = vmatpush.bf16.msra.mxu3 %v1762_v25  ;;  %958 = vmatpush.bf16.msra.mxu0 %v1826_v30  ;;  %v2273_v25 = vld [vmem:[%s3653_s1 + $0x114] sm:$0xf]  ;;  %v1783_v30 = vld [vmem:[%s3653_s1 + $0x88] sm:$0xf0] }
  0x4e   :  { %v1858_v28 = vor.u32 %v2273_v25, %v1855_v26  ;;  %v1786_v35 = vor.u32 %v2255_v29, %v1783_v30  ;;  %v3167_v25 = vpack.c.bf16 %v84_v18, %v77_v17  ;;  %v2297_v29 = vld [vmem:[%s3653_s1 + $0x1d4] sm:$0xf]  ;;  %v1951_v30 = vld [vmem:[%s3653_s1 + $0x1d8] sm:$0xf0]  ;;  %v53_v18 = vld [vmem:[%s3654_s0 + $0xa0] sm:$0xff] }
  0x4f   :  { %987 = vmatpush.bf16.msra.mxu1 %v1890_v33  ;;  %v65_v33 = vld [vmem:[%s3654_s0 + $0x100] sm:$0xff]  ;;  %v1954_v32 = vor.u32 %v2297_v29, %v1951_v30  ;;  %v2325_v17 = vld [vmem:[%s3653_s1 + $0x2b4] sm:$0xf]  ;;  %v1919_v29 = vld [vmem:[%s3653_s1 + $0x198] sm:$0xf0] }
  0x50   :  { %v2305_v30 = vld [vmem:[%s3653_s1 + $0x214] sm:$0xf] }
  0x51   :  { %930 = vmatpush.bf16.msra.mxu3 %v1754_v34  ;;  %959 = vmatpush.bf16.msra.mxu0 %v1818_v41  ;;  %v72_v34 = vld [vmem:[%s3654_s0 + $0x138] sm:$0xff] }
  0x52   :  { %v3091_v41 = vpack.c.bf16 %v72_v34, %v65_v33  ;;  %v2015_v33 = vld [vmem:[%s3653_s1 + $0x258] sm:$0xf0]  ;;  %v2331_v34 = vld [vmem:[%s3653_s1 + $0x2e4] sm:$0xf] }
  0x53   :  { %988 = vmatpush.bf16.msra.mxu1 %v1882_v48  ;;  %795 = vmatmul.bf16.gmra.mxu2 %v3011_v57  ;;  %v1967_v48 = vld [vmem:[%s3653_s1 + $0x1f8] sm:$0xf0]  ;;  %v2018_v36 = vor.u32 %v2313_v31, %v2015_v33 }
  0x54   :  { %853 = vmatmul.bf16.gmra.mxu0 %v3013_v58 }
  0x55   :  { %931 = vmatpush.bf16.msra.mxu3 %v1746_v50  ;;  %960 = vmatpush.bf16.msra.mxu0 %v1810_v56  ;;  %v1970_v50 = vor.u32 %v2301_v47, %v1967_v48  ;;  %v2023_v56 = vld [vmem:[%s3653_s1 + $0x268] sm:$0xf0]  ;;  %v2329_v47 = vld [vmem:[%s3653_s1 + $0x2d4] sm:$0xf]  ;;  %v2079_v48 = vld [vmem:[%s3653_s1 + $0x2d8] sm:$0xf0] }
  0x56   :  { %824 = vmatmul.bf16.gmra.mxu3 %v3015_v59  ;;  %882 = vmatmul.bf16.gmra.mxu1 %v3017_v61 }
  0x57   :  { %989 = vmatpush.bf16.msra.mxu1 %v1874_v60  ;;  %v2333_v60 = vld [vmem:[%s3653_s1 + $0x2f4] sm:$0xf]  ;;  %1014 = vmatpush.bf16.msrb.mxu2 %v1970_v50  ;;  %v2082_v50 = vor.u32 %v2329_v47, %v2079_v48  ;;  %v1978_v47 = vor.u32 %v2303_v38, %v1975_v39  ;;  %v2047_v48 = vld [vmem:[%s3653_s1 + $0x298] sm:$0xf0] }
  0x58   :  { %v2098_v14 = vor.u32 %v2333_v60, %v2095_v1 }
  0x59   :  { %932 = vmatpush.bf16.msra.mxu3 %v1738_v62  ;;  %961 = vmatpush.bf16.msra.mxu0 %v1802_v16  ;;  %v1962_v62 = vor.u32 %v2299_v52, %v1959_v53  ;;  %v2106_v16 = vor.u32 %v2335_v2, %v2103_v11  ;;  %v46_v52 = vld [vmem:[%s3654_s0 + $0x68] sm:$0xff] }
  0x5a   :  { %v3221_v53 = vpack.c.bf16 %v46_v52, %v39_v51  ;;  %v1927_v11 = vld [vmem:[%s3653_s1 + $0x1a8] sm:$0xf0] }
  0x5b   :  { %990 = vmatpush.bf16.msra.mxu1 %v1866_v20  ;;  %1015 = vmatpush.bf16.msrb.mxu2 %v1962_v62  ;;  %v86_v20 = vld [vmem:[%s3654_s0 + $0x1a8] sm:$0xff] }
  0x5c   :  { %v3169_v26 = vpack.c.bf16 %v86_v20, %v79_v19  ;;  %v2071_v62 = vld [vmem:[%s3653_s1 + $0x2c8] sm:$0xf0]  ;;  %v60_v19 = vld [vmem:[%s3654_s0 + $0xd8] sm:$0xff] }
  0x5d   :  { %933 = vmatpush.bf16.msra.mxu3 %v1730_v12  ;;  %962 = vmatpush.bf16.msra.mxu0 %v1794_v24  ;;  %v2026_v12 = vor.u32 %v2315_v55, %v2023_v56  ;;  %v87_v24 = vld [vmem:[%s3654_s0 + $0x1b0] sm:$0xff]  ;;  %v1935_v55 = vld [vmem:[%s3653_s1 + $0x1b8] sm:$0xf0] }
  0x5e   :  { %v2309_v56 = vld [vmem:[%s3653_s1 + $0x234] sm:$0xf] }
  0x5f   :  { %991 = vmatpush.bf16.msra.mxu1 %v1858_v28  ;;  %v3173_v28 = vpack.c.bf16 %v87_v24, %v80_v23  ;;  %1016 = vmatpush.bf16.msrb.mxu2 %v1954_v32  ;;  %v3270_v23 = vpack.c.bf16 %v60_v19, %v53_v18  ;;  %v2289_v24 = vld [vmem:[%s3653_s1 + $0x194] sm:$0xf]  ;;  %v2055_v32 = vld [vmem:[%s3653_s1 + $0x2a8] sm:$0xf0] }
  0x60   :  { %v1922_v31 = vor.u32 %v2289_v24, %v1919_v29 }
  0x61   :  { %934 = vmatpush.bf16.msra.mxu3 %v1722_v27  ;;  %963 = vmatpush.bf16.msra.mxu0 %v1786_v35  ;;  %v3171_v27 = vpack.c.bf16 %v85_v22, %v78_v21  ;;  %v2087_v35 = vld [vmem:[%s3653_s1 + $0x2e8] sm:$0xf0]  ;;  %v2063_v21 = vld [vmem:[%s3653_s1 + $0x2b8] sm:$0xf0] }
  0x62   :  { %v2090_v37 = vor.u32 %v2331_v34, %v2087_v35  ;;  %v2066_v22 = vor.u32 %v2325_v17, %v2063_v21  ;;  %v1911_v35 = vld [vmem:[%s3653_s1 + $0x188] sm:$0xf0]  ;;  %v81_v17 = vld [vmem:[%s3654_s0 + $0x180] sm:$0xff] }
  0x63   :  { %800 = vmatmul.bf16.gmra.mxu2 %v3089_v40  ;;  %992 = vmatpush.bf16.msra.mxu1 %v1850_v46  ;;  %v2007_v46 = vld [vmem:[%s3653_s1 + $0x248] sm:$0xf0] }
  0x64   :  { %858 = vmatmul.bf16.gmra.mxu0 %v3091_v41  ;;  %v2010_v49 = vor.u32 %v2311_v44, %v2007_v46  ;;  %1017 = vmatpush.bf16.msrb.mxu2 %v1946_v45  ;;  %v2321_v44 = vld [vmem:[%s3653_s1 + $0x294] sm:$0xf]  ;;  %v74_v46 = vld [vmem:[%s3654_s0 + $0x148] sm:$0xff] }
  0x65   :  { %1043 = vmatpush.bf16.msrb.mxu3 %v2034_v54  ;;  %1072 = vmatpush.bf16.msrb.mxu0 %v2098_v14  ;;  %v2293_v54 = vld [vmem:[%s3653_s1 + $0x1b4] sm:$0xf]  ;;  %v2307_v14 = vld [vmem:[%s3653_s1 + $0x224] sm:$0xf] }
  0x66   :  { %829 = vmatmul.bf16.gmra.mxu3 %v3093_v42  ;;  %887 = vmatmul.bf16.gmra.mxu1 %v3095_v43  ;;  %v1938_v60 = vor.u32 %v2293_v54, %v1935_v55  ;;  %v67_v45 = vld [vmem:[%s3654_s0 + $0x110] sm:$0xff]  ;;  %v2319_v54 = vld [vmem:[%s3653_s1 + $0x284] sm:$0xf]  ;;  %v2039_v55 = vld [vmem:[%s3653_s1 + $0x288] sm:$0xf0] }
  0x67   :  { %1108 = vmatpush.bf16.msrb.mxu1 %v2106_v16  ;;  %v1991_v16 = vld [vmem:[%s3653_s1 + $0x228] sm:$0xf0]  ;;  %v3325_v51 = vpack.c.bf16 %v74_v46, %v67_v45 }
  0x68   :  { %1018 = vmatpush.bf16.msrb.mxu2 %v1938_v60  ;;  %v1994_v20 = vor.u32 %v2307_v14, %v1991_v16  ;;  %v2042_v60 = vor.u32 %v2319_v54, %v2039_v55 }
  0x69   :  { %1044 = vmatpush.bf16.msrb.mxu3 %v2026_v12  ;;  %1073 = vmatpush.bf16.msrb.mxu0 %v2090_v37 }
  0x6d   :  { %1045 = vmatpush.bf16.msrb.mxu3 %v2018_v36  ;;  %1074 = vmatpush.bf16.msrb.mxu0 %v2082_v50  ;;  %v3304_v36 = vld [vmem:[%s3655_s2] sm:$0x3] }
  0x6e   :  { %v217_v50 = vperm.slane %v3304_v36, 0 }
  0x71   :  { %1046 = vmatpush.bf16.msrb.mxu3 %v2010_v49  ;;  %v2050_v49 = vor.u32 %v2321_v44, %v2047_v48 }
  0x73   :  { %805 = vmatmul.bf16.gmra.mxu2 %v3167_v25 }
  0x74   :  { %863 = vmatmul.bf16.gmra.mxu0 %v3169_v26 }
  0x76   :  { %834 = vmatmul.bf16.gmra.mxu3 %v3171_v27  ;;  %892 = vmatmul.bf16.gmra.mxu1 %v3173_v28 }
  0x83   :  { %2107 = vmatmul.msk.bf16.vlgmr.msra.gmra.mxu2 %vm711_vm0, %v3221_v53 }
  0x84   :  { %964 = vmatmul.bf16.vlgmr.msra.gmra.mxu0 %v2651_v10  ;;  %v1999_v10 = vld [vmem:[%s3653_s1 + $0x238] sm:$0xf0] }
  0x85   :  { %v2002_v1 = vor.u32 %v2309_v56, %v1999_v10 }
  0x86   :  { %935 = vmatmul.bf16.vlgmr.msra.gmra.mxu3 %v2638_v4  ;;  %993 = vmatmul.bf16.vlgmr.msra.gmra.mxu1 %v2903_v5  ;;  %v2327_v4 = vld [vmem:[%s3653_s1 + $0x2c4] sm:$0xf] }
  0x87   :  { %v2074_v2 = vor.u32 %v2327_v4, %v2071_v62  ;;  %1047 = vmatpush.bf16.msrb.mxu3 %v2002_v1  ;;  %v2291_v5 = vld [vmem:[%s3653_s1 + $0x1a4] sm:$0xf] }
  0x88   :  { %v1930_v12 = vor.u32 %v2291_v5, %v1927_v11 }
  0x89   :  { %1075 = vmatpush.bf16.msrb.mxu0 %v2074_v2 }
  0x8a   :  { %1019 = vmatpush.bf16.msrb.mxu2 %v1930_v12 }
  0x8b   :  { %1048 = vmatpush.bf16.msrb.mxu3 %v1994_v20 }
  0x8d   :  { %1076 = vmatpush.bf16.msrb.mxu0 %v2066_v22 }
  0x8e   :  { %1020 = vmatpush.bf16.msrb.mxu2 %v1922_v31 }
  0x93   :  { %2108 = vmatmul.msk.bf16.gmra.mxu2 %vm711_vm0, %v3270_v23 }
  0x94   :  { %969 = vmatmul.bf16.gmra.mxu0 %v2783_v9  ;;  %v1983_v9 = vld [vmem:[%s3653_s1 + $0x218] sm:$0xf0] }
  0x95   :  { %v1986_v33 = vor.u32 %v2305_v30, %v1983_v9 }
  0x96   :  { %940 = vmatmul.bf16.gmra.mxu3 %v2770_v0  ;;  %998 = vmatmul.bf16.gmra.mxu1 %v3011_v57  ;;  %v2323_v0 = vld [vmem:[%s3653_s1 + $0x2a4] sm:$0xf] }
  0x97   :  { %v2058_v34 = vor.u32 %v2323_v0, %v2055_v32  ;;  %1049 = vmatpush.bf16.msrb.mxu3 %v1986_v33  ;;  %v2287_v57 = vld [vmem:[%s3653_s1 + $0x184] sm:$0xf] }
  0x98   :  { %v1914_v37 = vor.u32 %v2287_v57, %v1911_v35 }
  0x99   :  { %1077 = vmatpush.bf16.msrb.mxu0 %v2058_v34 }
  0x9a   :  { %1021 = vmatpush.bf16.msrb.mxu2 %v1914_v37 }
  0x9b   :  { %1050 = vmatpush.bf16.msrb.mxu3 %v1978_v47 }
  0x9d   :  { %1078 = vmatpush.bf16.msrb.mxu0 %v2050_v49 }
  0xa0   :  { %v733_v52 = vpop.f32.mrf.mxu0 }
  0xa1   :  { %v734_v56 = vadd.f32 %v733_v52, %v217_v50  ;;  %1079 = vmatpush.bf16.msrb.mxu0 %v2042_v60 }
  0xa3   :  { %v762_v10 = vpop.f32.mrf.mxu1  ;;  %2109 = vmatmul.msk.bf16.gmra.mxu2 %vm711_vm0, %v3325_v51 }
  0xa4   :  { %v763_v4 = vadd.f32 %v762_v10, %v734_v56  ;;  %974 = vmatmul.bf16.gmra.mxu0 %v2649_v8 }
  0xa6   :  { %945 = vmatmul.bf16.gmra.mxu3 %v2636_v3  ;;  %1003 = vmatmul.bf16.gmra.mxu1 %v3089_v40  ;;  %v743_v62 = vpop.f32.mrf.mxu2  ;;  %v88_v3 = vld [vmem:[%s3654_s0 + $0x1b8] sm:$0xff] }
  0xa7   :  { %v744_v1 = vadd.f32 %v743_v62, %v217_v50  ;;  %v772_v2 = vpop.f32.mrf.mxu3  ;;  %v3348_v19 = vpack.c.bf16 %v88_v3, %v81_v17 }
  0xa8   :  { %v735_v5 = vpop.f32.mrf.mxu0 }
  0xa9   :  { %v3338_v11 = vadd.f32 %v772_v2, %v744_v1  ;;  %v736_v12 = vadd.f32 %v735_v5, %v217_v50  ;;  %v2341_v5 = vld [vmem:[%s3656_s3 + $0x20] sm:$0xff] }
  0xab   :  { %v764_v14 = vpop.f32.mrf.mxu1 }
  0xac   :  { %v3340_v16 = vadd.f32 %v764_v14, %v736_v12  ;;  %v2340_v14 = vld [vmem:[%s3656_s3 + $0x18] sm:$0xff] }
  0xae   :  { %v745_v8 = vpop.f32.mrf.mxu2 }
  0xaf   :  { %v746_v40 = vadd.f32 %v745_v8, %v217_v50  ;;  %v774_v18 = vpop.f32.mrf.mxu3 }
  0xb1   :  { %v738_v20 = vpop.f32.mrf.mxu0  ;;  %v3350_v21 = vadd.f32 %v774_v18, %v746_v40 }
  0xb2   :  { %v739_v22 = vadd.f32 %v738_v20, %v217_v50 }
  0xb3   :  { %v767_v24 = vpop.f32.mrf.mxu1  ;;  %2110 = vmatmul.msk.bf16.gmra.mxu2 %vm711_vm0, %v3348_v19 }
  0xb4   :  { %v768_v29 = vadd.f32 %v767_v24, %v739_v22  ;;  %979 = vmatmul.bf16.gmra.mxu0 %v2781_v6 }
  0xb6   :  { %950 = vmatmul.bf16.gmra.mxu3 %v2768_v63  ;;  %1008 = vmatmul.bf16.gmra.mxu1 %v3167_v25  ;;  %v748_v30 = vpop.f32.mrf.mxu2 }
  0xb7   :  { %v749_v31 = vadd.f32 %v748_v30, %v217_v50 }
  0xb9   :  { %v777_v9 = vpop.f32.mrf.mxu3  ;;  %v740_v0 = vpop.f32.mrf.mxu0 }
  0xba   :  { %v3357_v32 = vadd.f32 %v777_v9, %v749_v31  ;;  %v741_v33 = vadd.f32 %v740_v0, %v217_v50 }
  0xbb   :  { %v769_v34 = vpop.f32.mrf.mxu1 }
  0xbc   :  { %v3359_v57 = vadd.f32 %v769_v34, %v741_v33 }
  0xbe   :  { %v750_v35 = vpop.f32.mrf.mxu2 }
  0xbf   :  { %v751_v37 = vadd.f32 %v750_v35, %v217_v50 }
  0xc1   :  { %v779_v38 = vpop.f32.mrf.mxu3  ;;  %v849_v39 = vpop.f32.mrf.mxu0 }
  0xc2   :  { %v3361_v44 = vadd.f32 %v779_v38, %v751_v37 }
  0xc3   :  { %v878_v6 = vpop.f32.mrf.mxu1  ;;  %1022 = vmatmul.bf16.vlgmr.msrb.gmra.mxu2 %v2913_v13 }
  0xc4   :  { %1080 = vmatmul.bf16.vlgmr.msrb.gmra.mxu0 %v2915_v15 }
  0xc6   :  { %1051 = vmatmul.bf16.vlgmr.msrb.gmra.mxu3 %v2905_v7  ;;  %2111 = vmatmul.msk.bf16.vlgmr.msrb.gmra.mxu1 %vm711_vm0, %v3221_v53  ;;  %v791_v63 = vpop.f32.mrf.mxu2  ;;  %v2344_v53 = vld [vmem:[%s3656_s3 + $0x38] sm:$0xff] }
  0xc7   :  { %v792_v25 = vadd.f32 %v791_v63, %v763_v4  ;;  %1286 = vmatpush.bf16.msra.mxu2 %v2344_v53  ;;  %v3458_v63 = vperm.slane %v3304_v36, 1  ;;  %v2350_v53 = vld [vmem:[%s3656_s3 + $0x68] sm:$0xff] }
  0xc9   :  { %v820_v45 = vpop.f32.mrf.mxu3  ;;  %v3368_v46 = vpop.f32.mrf.mxu0 }
  0xca   :  { %v821_v47 = vadd.f32 %v820_v45, %v792_v25 }
  0xcb   :  { %v3370_v48 = vpop.f32.mrf.mxu1 }
  0xcc   :  { %v850_v49 = vadd.f32 %v849_v39, %v821_v47 }
  0xce   :  { %v3372_v50 = vadd.f32 %v878_v6, %v850_v49  ;;  %v3374_v52 = vpop.f32.mrf.mxu2  ;;  %v2351_v6 = vld [vmem:[%s3656_s3 + $0x70] sm:$0xff] }
  0xd1   :  { %v3376_v13 = vpop.f32.mrf.mxu3  ;;  %v854_v15 = vpop.f32.mrf.mxu0 }
  0xd3   :  { %v883_v7 = vpop.f32.mrf.mxu1  ;;  %1027 = vmatmul.bf16.gmra.mxu2 %v3015_v59  ;;  %v2343_v59 = vld [vmem:[%s3656_s3 + $0x30] sm:$0xff] }
  0xd4   :  { %1085 = vmatmul.bf16.gmra.mxu0 %v3017_v61  ;;  %1287 = vmatpush.bf16.msra.mxu2 %v2343_v59 }
  0xd6   :  { %1056 = vmatmul.bf16.gmra.mxu3 %v3013_v58  ;;  %2112 = vmatmul.msk.bf16.gmra.mxu1 %vm711_vm0, %v3270_v23  ;;  %v796_v54 = vpop.f32.mrf.mxu2  ;;  %v2342_v23 = vld [vmem:[%s3656_s3 + $0x28] sm:$0xff] }
  0xd7   :  { %v797_v55 = vadd.f32 %v796_v54, %v768_v29  ;;  %v2337_v29 = vld [vmem:[%s3656_s3] sm:$0xff] }
  0xd8   :  { %1288 = vmatpush.bf16.msra.mxu2 %v2342_v23 }
  0xd9   :  { %v825_v56 = vpop.f32.mrf.mxu3  ;;  %v3386_v60 = vpop.f32.mrf.mxu0 }
  0xda   :  { %v826_v10 = vadd.f32 %v825_v56, %v797_v55 }
  0xdb   :  { %v3391_v61 = vpop.f32.mrf.mxu1 }
  0xdc   :  { %v855_v58 = vadd.f32 %v854_v15, %v826_v10  ;;  %1289 = vmatpush.bf16.msra.mxu2 %v2341_v5 }
  0xde   :  { %v3396_v4 = vadd.f32 %v883_v7, %v855_v58  ;;  %v3398_v62 = vpop.f32.mrf.mxu2 }
  0xe0   :  { %1290 = vmatpush.bf16.msra.mxu2 %v2340_v14 }
  0xe1   :  { %v3400_v1 = vpop.f32.mrf.mxu3  ;;  %v859_v2 = vpop.f32.mrf.mxu0 }
  0xe3   :  { %v888_v12 = vpop.f32.mrf.mxu1  ;;  %1032 = vmatmul.bf16.gmra.mxu2 %v3093_v42 }
  0xe4   :  { %1090 = vmatmul.bf16.gmra.mxu0 %v3095_v43 }
  0xe6   :  { %1061 = vmatmul.bf16.gmra.mxu3 %v3091_v41  ;;  %2113 = vmatmul.msk.bf16.gmra.mxu1 %vm711_vm0, %v3325_v51  ;;  %v801_v17 = vpop.f32.mrf.mxu2  ;;  %v2339_v41 = vld [vmem:[%s3656_s3 + $0x10] sm:$0xff]  ;;  %v2338_v51 = vld [vmem:[%s3656_s3 + $0x8] sm:$0xff] }
  0xe7   :  { %v802_v3 = vadd.f32 %v801_v17, %v3338_v11  ;;  %1291 = vmatpush.bf16.msra.mxu2 %v2339_v41 }
  0xe9   :  { %v830_v8 = vpop.f32.mrf.mxu3  ;;  %v3414_v40 = vpop.f32.mrf.mxu0 }
  0xea   :  { %v831_v42 = vadd.f32 %v830_v8, %v802_v3 }
  0xeb   :  { %v3419_v43 = vpop.f32.mrf.mxu1  ;;  %1292 = vmatpush.bf16.msra.mxu2 %v2338_v51 }
  0xec   :  { %v860_v18 = vadd.f32 %v859_v2, %v831_v42  ;;  %v2348_v42 = vld [vmem:[%s3656_s3 + $0x58] sm:$0xff] }
  0xee   :  { %v3424_v20 = vadd.f32 %v888_v12, %v860_v18  ;;  %v3426_v11 = vpop.f32.mrf.mxu2  ;;  %v2349_v12 = vld [vmem:[%s3656_s3 + $0x60] sm:$0xff] }
  0xef   :  { %1293 = vmatpush.bf16.msra.mxu2 %v2337_v29 }
  0xf1   :  { %v3428_v22 = vpop.f32.mrf.mxu3  ;;  %v864_v24 = vpop.f32.mrf.mxu0 }
  0xf3   :  { %v893_v30 = vpop.f32.mrf.mxu1  ;;  %1037 = vmatmul.bf16.gmra.mxu2 %v3171_v27  ;;  %v2352_v27 = vld [vmem:[%s3656_s3 + $0x78] sm:$0xff] }
  0xf4   :  { %1095 = vmatmul.bf16.gmra.mxu0 %v3173_v28  ;;  %1315 = vmatpush.bf16.msra.mxu3 %v2352_v27  ;;  %v2347_v27 = vld [vmem:[%s3656_s3 + $0x50] sm:$0xff] }
  0xf6   :  { %1066 = vmatmul.bf16.gmra.mxu3 %v3169_v26  ;;  %2114 = vmatmul.msk.bf16.gmra.mxu1 %vm711_vm0, %v3348_v19  ;;  %v806_v31 = vpop.f32.mrf.mxu2 }
  0xf7   :  { %v807_v9 = vadd.f32 %v806_v31, %v3357_v32  ;;  %v794_v32 = vadd.f32 %v3374_v52, %v3340_v16 }
  0xf8   :  { %1316 = vmatpush.bf16.msra.mxu3 %v2351_v6 }
  0xf9   :  { %v835_v0 = vpop.f32.mrf.mxu3  ;;  %v3439_v33 = vpop.f32.mrf.mxu0  ;;  %v823_v25 = vadd.f32 %v3376_v13, %v794_v32 }
  0xfa   :  { %v836_v34 = vadd.f32 %v835_v0, %v807_v9 }
  0xfb   :  { %v3441_v35 = vpop.f32.mrf.mxu1  ;;  %v852_v7 = vadd.f32 %v3368_v46, %v823_v25  ;;  %v799_v46 = vadd.f32 %v3398_v62, %v3359_v57 }
  0xfc   :  { %v865_v28 = vadd.f32 %v864_v24, %v836_v34  ;;  %1317 = vmatpush.bf16.msra.mxu3 %v2350_v53 }
  0xfd   :  { %v881_v54 = vadd.f32 %v3370_v48, %v852_v7  ;;  %v2346_v7 = vld [vmem:[%s3656_s3 + $0x48] sm:$0xff] }
  0xfe   :  { %v3446_v26 = vadd.f32 %v893_v30, %v865_v28  ;;  %v3448_v37 = vpop.f32.mrf.mxu2 }
 0x100   :  { %1318 = vmatpush.bf16.msra.mxu3 %v2349_v12 }
 0x101   :  { %v3450_v19 = vpop.f32.mrf.mxu3  ;;  %v965_v38 = vpop.f32.mrf.mxu0 }
 0x103   :  { %v994_v39 = vpop.f32.mrf.mxu1 }
 0x104   :  { %1319 = vmatpush.bf16.msra.mxu3 %v2348_v42 }
 0x106   :  { %v907_v45 = vpop.f32.mrf.mxu2 }
 0x107   :  { %v908_v13 = vadd.f32 %v907_v45, %v3372_v50  ;;  %v828_v50 = vadd.f32 %v3400_v1, %v799_v46 }
 0x108   :  { %1320 = vmatpush.bf16.msra.mxu3 %v2347_v27 }
 0x109   :  { %v936_v47 = vpop.f32.mrf.mxu3  ;;  %v3462_v15 = vpop.f32.mrf.mxu0  ;;  %v1130_v58 = vmax.f32 %v908_v13, 0.0  ;;  %v857_v57 = vadd.f32 %v3386_v60, %v828_v50  ;;  %v804_v60 = vadd.f32 %v3426_v11, %v3350_v21 }
 0x10a   :  { %v937_v49 = vadd.f32 %v936_v47, %v3458_v63 }
 0x10b   :  { %v3465_v52 = vpop.f32.mrf.mxu1  ;;  %v886_v18 = vadd.f32 %v3391_v61, %v857_v57 }
 0x10c   :  { %v966_v16 = vadd.f32 %v965_v38, %v937_v49  ;;  %1321 = vmatpush.bf16.msra.mxu3 %v2346_v7 }
 0x10e   :  { %v3470_v36 = vadd.f32 %v994_v39, %v966_v16  ;;  %v909_v55 = vpop.f32.mrf.mxu2 }
 0x10f   :  { %v910_v56 = vadd.f32 %v909_v55, %v881_v54 }
 0x111   :  { %v3474_v10 = vpop.f32.mrf.mxu3  ;;  %v970_v59 = vpop.f32.mrf.mxu0  ;;  %v1132_v23 = vmax.f32 %v910_v56, 0.0 }
 0x113   :  { %v999_v2 = vpop.f32.mrf.mxu1  ;;  %v1146_v5 = vpack.c.bf16 %v1132_v23, %v1130_v58 }
 0x115   :  { %1294 = vmatmul.bf16.vlgmr.msra.gmra.mxu2 %v1146_v5 }
 0x116   :  { %v912_v48 = vpop.f32.mrf.mxu2 }
 0x117   :  { %v913_v1 = vadd.f32 %v912_v48, %v3396_v4  ;;  %v833_v4 = vadd.f32 %v3428_v22, %v804_v60 }
 0x119   :  { %v941_v14 = vpop.f32.mrf.mxu3  ;;  %v3483_v3 = vpop.f32.mrf.mxu0  ;;  %v1134_v31 = vmax.f32 %v913_v1, 0.0  ;;  %v862_v21 = vadd.f32 %v3414_v40, %v833_v4  ;;  %v809_v40 = vadd.f32 %v3448_v37, %v3361_v44 }
 0x11a   :  { %v942_v17 = vadd.f32 %v941_v14, %v3458_v63 }
 0x11b   :  { %v3486_v8 = vpop.f32.mrf.mxu1  ;;  %v891_v45 = vadd.f32 %v3419_v43, %v862_v21 }
 0x11c   :  { %v971_v62 = vadd.f32 %v970_v59, %v942_v17  ;;  %v2345_v59 = vld [vmem:[%s3656_s3 + $0x40] sm:$0xff] }
 0x11d   :  { %1322 = vmatpush.bf16.msra.mxu3 %v2345_v59 }
 0x11e   :  { %v3491_v41 = vadd.f32 %v999_v2, %v971_v62  ;;  %v914_v51 = vpop.f32.mrf.mxu2 }
 0x11f   :  { %v915_v24 = vadd.f32 %v914_v51, %v886_v18 }
 0x121   :  { %v3495_v29 = vpop.f32.mrf.mxu3  ;;  %v975_v30 = vpop.f32.mrf.mxu0  ;;  %v1136_v9 = vmax.f32 %v915_v24, 0.0 }
 0x123   :  { %v1004_v0 = vpop.f32.mrf.mxu1  ;;  %v1148_v34 = vpack.c.bf16 %v1136_v9, %v1134_v31 }
 0x125   :  { %1299 = vmatmul.bf16.gmra.mxu2 %v1148_v34 }
 0x126   :  { %v917_v61 = vpop.f32.mrf.mxu2 }
 0x127   :  { %v918_v25 = vadd.f32 %v917_v61, %v3424_v20  ;;  %v838_v20 = vadd.f32 %v3450_v19, %v809_v40 }
 0x129   :  { %v946_v28 = vpop.f32.mrf.mxu3  ;;  %v3504_v32 = vpop.f32.mrf.mxu0  ;;  %v1138_v53 = vmax.f32 %v918_v25, 0.0  ;;  %v867_v44 = vadd.f32 %v3439_v33, %v838_v20  ;;  %v939_v33 = vadd.f32 %v3474_v10, %v3458_v63 }
 0x12a   :  { %v947_v38 = vadd.f32 %v946_v28, %v3458_v63 }
 0x12b   :  { %v3507_v39 = vpop.f32.mrf.mxu1  ;;  %v896_v5 = vadd.f32 %v3441_v35, %v867_v44  ;;  %v968_v35 = vadd.f32 %v3462_v15, %v939_v33 }
 0x12c   :  { %v976_v11 = vadd.f32 %v975_v30, %v947_v38 }
 0x12d   :  { %v997_v60 = vadd.f32 %v3465_v52, %v968_v35 }
 0x12e   :  { %v3509_v6 = vadd.f32 %v1004_v0, %v976_v11  ;;  %v919_v22 = vpop.f32.mrf.mxu2 }
 0x12f   :  { %v920_v47 = vadd.f32 %v919_v22, %v891_v45 }
 0x131   :  { %v3513_v49 = vpop.f32.mrf.mxu3  ;;  %v980_v16 = vpop.f32.mrf.mxu0  ;;  %v1140_v13 = vmax.f32 %v920_v47, 0.0 }
 0x133   :  { %v1009_v54 = vpop.f32.mrf.mxu1  ;;  %v1150_v55 = vpack.c.bf16 %v1140_v13, %v1138_v53 }
 0x135   :  { %1304 = vmatmul.bf16.gmra.mxu2 %v1150_v55 }
 0x136   :  { %v922_v43 = vpop.f32.mrf.mxu2 }
 0x137   :  { %v923_v19 = vadd.f32 %v922_v43, %v3446_v26 }
 0x139   :  { %v951_v56 = vpop.f32.mrf.mxu3  ;;  %v3525_v58 = vpop.f32.mrf.mxu0  ;;  %v1142_v17 = vmax.f32 %v923_v19, 0.0 }
 0x13a   :  { %v952_v46 = vadd.f32 %v951_v56, %v3458_v63 }
 0x13b   :  { %v3528_v23 = vpop.f32.mrf.mxu1 }
 0x13c   :  { %v981_v37 = vadd.f32 %v980_v16, %v952_v46 }
 0x13e   :  { %v3530_v2 = vadd.f32 %v1009_v54, %v981_v37  ;;  %v924_v12 = vpop.f32.mrf.mxu2 }
 0x13f   :  { %v925_v50 = vadd.f32 %v924_v12, %v896_v5 }
 0x141   :  { %v3534_v48 = vpop.f32.mrf.mxu3  ;;  %v1081_v14 = vpop.f32.mrf.mxu0  ;;  %v1144_v57 = vmax.f32 %v925_v50, 0.0 }
 0x143   :  { %v1110_v62 = vpop.f32.mrf.mxu1  ;;  %v1152_v42 = vpack.c.bf16 %v1144_v57, %v1142_v17 }
 0x145   :  { %1309 = vmatmul.bf16.gmra.mxu2 %v1152_v42 }
 0x146   :  { %v1023_v1 = vpop.f32.mrf.mxu2 }
 0x147   :  { %v1024_v18 = vadd.f32 %v1023_v1, %v3470_v36  ;;  %v944_v36 = vadd.f32 %v3495_v29, %v3458_v63 }
 0x149   :  { %v1052_v51 = vpop.f32.mrf.mxu3  ;;  %v1083_v26 = vpop.f32.mrf.mxu0  ;;  %v973_v52 = vadd.f32 %v3483_v3, %v944_v36 }
 0x14a   :  { %v1053_v30 = vadd.f32 %v1052_v51, %v1024_v18 }
 0x14b   :  { %v1112_v24 = vpop.f32.mrf.mxu1  ;;  %v1002_v40 = vadd.f32 %v3486_v8, %v973_v52  ;;  %v2357_v52 = vld [vmem:[%s3658_s5 + $0x20] sm:$0xff] }
 0x14c   :  { %v1082_v9 = vadd.f32 %v1081_v14, %v1053_v30 }
 0x14e   :  { %v1025_v31 = vpop.f32.mrf.mxu2  ;;  %v1111_v10 = vadd.f32 %v1110_v62, %v1082_v9 }
 0x14f   :  { %v1026_v0 = vadd.f32 %v1025_v31, %v997_v60 }
 0x150   :  { %v1131_v11 = vmax.f32 %v1111_v10, 0.0 }
 0x151   :  { %v1054_v34 = vpop.f32.mrf.mxu3  ;;  %v1086_v27 = vpop.f32.mrf.mxu0 }
 0x152   :  { %v1055_v4 = vadd.f32 %v1054_v34, %v1026_v0 }
 0x153   :  { %v1115_v61 = vpop.f32.mrf.mxu1 }
 0x154   :  { %v1084_v28 = vadd.f32 %v1083_v26, %v1055_v4 }
 0x156   :  { %v1113_v38 = vadd.f32 %v1112_v24, %v1084_v28  ;;  %v1028_v21 = vpop.f32.mrf.mxu2 }
 0x157   :  { %v1029_v25 = vadd.f32 %v1028_v21, %v3491_v41  ;;  %v949_v41 = vadd.f32 %v3513_v49, %v3458_v63 }
 0x158   :  { %v1133_v15 = vmax.f32 %v1113_v38, 0.0 }
 0x159   :  { %v1057_v45 = vpop.f32.mrf.mxu3  ;;  %v1088_v47 = vpop.f32.mrf.mxu0  ;;  %v978_v8 = vadd.f32 %v3504_v32, %v949_v41 }
 0x15a   :  { %v1147_v22 = vpack.c.bf16 %v1133_v15, %v1131_v11  ;;  %v1058_v7 = vadd.f32 %v1057_v45, %v1029_v25  ;;  %v2358_v45 = vld [vmem:[%s3658_s5 + $0x28] sm:$0xff] }
 0x15b   :  { %v1117_v16 = vpop.f32.mrf.mxu1  ;;  %v1007_v14 = vadd.f32 %v3507_v39, %v978_v8 }
 0x15c   :  { %1323 = vmatmul.bf16.vlgmr.msra.gmra.mxu3 %v1147_v22  ;;  %v1087_v13 = vadd.f32 %v1086_v27, %v1058_v7  ;;  %v2356_v22 = vld [vmem:[%s3658_s5 + $0x18] sm:$0xff]  ;;  %v2354_v7 = vld [vmem:[%s3658_s5 + $0x8] sm:$0xff] }
 0x15e   :  { %v1030_v53 = vpop.f32.mrf.mxu2  ;;  %v1116_v20 = vadd.f32 %v1115_v61, %v1087_v13 }
 0x15f   :  { %v1031_v54 = vadd.f32 %v1030_v53, %v1002_v40 }
 0x160   :  { %v1135_v44 = vmax.f32 %v1116_v20, 0.0 }
 0x161   :  { %v1059_v29 = vpop.f32.mrf.mxu3  ;;  %v1091_v56 = vpop.f32.mrf.mxu0 }
 0x162   :  { %v1060_v55 = vadd.f32 %v1059_v29, %v1031_v54  ;;  %v2404_v54 = vld [vmem:[%s3657_s4] ss:$0 sm:$0xff] }
 0x163   :  { %v1120_v3 = vpop.f32.mrf.mxu1 }
 0x164   :  { %v1089_v43 = vadd.f32 %v1088_v47, %v1060_v55  ;;  %v2355_v47 = vld [vmem:[%s3658_s5 + $0x10] sm:$0xff] }
 0x166   :  { %v1118_v59 = vadd.f32 %v1117_v16, %v1089_v43  ;;  %v1033_v46 = vpop.f32.mrf.mxu2  ;;  %v2353_v16 = vld [vmem:[%s3658_s5] sm:$0xff] }
 0x167   :  { %v1034_v19 = vadd.f32 %v1033_v46, %v3509_v6  ;;  %v954_v6 = vadd.f32 %v3534_v48, %v3458_v63 }
 0x168   :  { %v1137_v37 = vmax.f32 %v1118_v59, 0.0 }
 0x169   :  { %v1062_v5 = vpop.f32.mrf.mxu3  ;;  %v1093_v17 = vpop.f32.mrf.mxu0  ;;  %v983_v31 = vadd.f32 %v3525_v58, %v954_v6  ;;  %v2360_v58 = vld [vmem:[%s3658_s5 + $0x38] sm:$0xff] }
 0x16a   :  { %v1149_v12 = vpack.c.bf16 %v1137_v37, %v1135_v44  ;;  %v1063_v50 = vadd.f32 %v1062_v5, %v1034_v19  ;;  %1424 = vmatpush.bf16.msra.mxu0 %v2360_v58 }
 0x16b   :  { %v1122_v33 = vpop.f32.mrf.mxu1  ;;  %v1012_v27 = vadd.f32 %v3528_v23, %v983_v31  ;;  %v2359_v23 = vld [vmem:[%s3658_s5 + $0x30] sm:$0xff] }
 0x16c   :  { %1328 = vmatmul.bf16.gmra.mxu3 %v1149_v12  ;;  %v1092_v62 = vadd.f32 %v1091_v56, %v1063_v50 }
 0x16e   :  { %v1035_v57 = vpop.f32.mrf.mxu2  ;;  %v1121_v18 = vadd.f32 %v1120_v3, %v1092_v62  ;;  %1425 = vmatpush.bf16.msra.mxu0 %v2359_v23 }
 0x16f   :  { %v1036_v42 = vadd.f32 %v1035_v57, %v1007_v14 }
 0x170   :  { %v1139_v32 = vmax.f32 %v1121_v18, 0.0 }
 0x171   :  { %v1064_v49 = vpop.f32.mrf.mxu3  ;;  %v1096_v39 = vpop.f32.mrf.mxu0 }
 0x172   :  { %v1065_v1 = vadd.f32 %v1064_v49, %v1036_v42  ;;  %1426 = vmatpush.bf16.msra.mxu0 %v2358_v45  ;;  %v2364_v42 = vld [vmem:[%s3660_s7 + $0x18] sm:$0xff] }
 0x173   :  { %v1125_v0 = vpop.f32.mrf.mxu1  ;;  %1518 = vmatpush.bf16.msra.mxu1 %v2364_v42 }
 0x174   :  { %v1094_v51 = vadd.f32 %v1093_v17, %v1065_v1  ;;  %v2363_v1 = vld [vmem:[%s3660_s7 + $0x10] sm:$0xff] }
 0x176   :  { %v1123_v26 = vadd.f32 %v1122_v33, %v1094_v51  ;;  %v1038_v35 = vpop.f32.mrf.mxu2  ;;  %1427 = vmatpush.bf16.msra.mxu0 %v2357_v52  ;;  %v2362_v51 = vld [vmem:[%s3660_s7 + $0x8] sm:$0xff] }
 0x177   :  { %v1039_v30 = vadd.f32 %v1038_v35, %v3530_v2  ;;  %1519 = vmatpush.bf16.msra.mxu1 %v2363_v1 }
 0x178   :  { %v1141_v24 = vmax.f32 %v1123_v26, 0.0 }
 0x179   :  { %v1067_v60 = vpop.f32.mrf.mxu3  ;;  %v1098_v28 = vpop.f32.mrf.mxu0 }
 0x17a   :  { %v1151_v9 = vpack.c.bf16 %v1141_v24, %v1139_v32  ;;  %v1068_v34 = vadd.f32 %v1067_v60, %v1039_v30  ;;  %1428 = vmatpush.bf16.msra.mxu0 %v2356_v22  ;;  %v2361_v24 = vld [vmem:[%s3660_s7] sm:$0xff] }
 0x17b   :  { %v1127_v21 = vpop.f32.mrf.mxu1  ;;  %1520 = vmatpush.bf16.msra.mxu1 %v2362_v51 }
 0x17c   :  { %1333 = vmatmul.bf16.gmra.mxu3 %v1151_v9  ;;  %v1097_v61 = vadd.f32 %v1096_v39, %v1068_v34 }
 0x17e   :  { %v1040_v4 = vpop.f32.mrf.mxu2  ;;  %v1126_v36 = vadd.f32 %v1125_v0, %v1097_v61  ;;  %1429 = vmatpush.bf16.msra.mxu0 %v2355_v47 }
 0x17f   :  { %v1041_v10 = vadd.f32 %v1040_v4, %v1012_v27  ;;  %1521 = vmatpush.bf16.msra.mxu1 %v2361_v24 }
 0x180   :  { %v1143_v11 = vmax.f32 %v1126_v36, 0.0 }
 0x181   :  { %v1069_v63 = vpop.f32.mrf.mxu3 }
 0x182   :  { %v1070_v48 = vadd.f32 %v1069_v63, %v1041_v10  ;;  %1430 = vmatpush.bf16.msra.mxu0 %v2354_v7 }
 0x184   :  { %v1099_v38 = vadd.f32 %v1098_v28, %v1070_v48 }
 0x186   :  { %v1128_v2 = vadd.f32 %v1127_v21, %v1099_v38  ;;  %1431 = vmatpush.bf16.msra.mxu0 %v2353_v16  ;;  %v2405_v38 = vld [vmem:[%s3659_s6] ss:$0 sm:$0xff] }
 0x188   :  { %v1145_v15 = vmax.f32 %v1128_v2, 0.0 }
 0x18a   :  { %v1153_v25 = vpack.c.bf16 %v1145_v15, %v1143_v11 }
 0x18c   :  { %1338 = vmatmul.bf16.gmra.mxu3 %v1153_v25 }
 0x198   :  { %v1295_v40 = vpop.f32.mrf.mxu2 }
 0x199   :  { %v1296_v55 = vadd.f32 %v2404_v54, %v1295_v40 }
 0x1a0   :  { %v1297_v53 = vpop.f32.mrf.mxu2 }
 0x1a1   :  { %v1298_v20 = vadd.f32 %v2404_v54, %v1297_v53 }
 0x1a8   :  { %v1300_v29 = vpop.f32.mrf.mxu2 }
 0x1a9   :  { %v1301_v19 = vadd.f32 %v2404_v54, %v1300_v29 }
 0x1b0   :  { %v1302_v46 = vpop.f32.mrf.mxu2 }
 0x1b1   :  { %v1303_v8 = vadd.f32 %v2404_v54, %v1302_v46 }
 0x1b8   :  { %v1305_v5 = vpop.f32.mrf.mxu2 }
 0x1b9   :  { %v1306_v18 = vadd.f32 %v2404_v54, %v1305_v5 }
 0x1c0   :  { %v1307_v49 = vpop.f32.mrf.mxu2 }
 0x1c1   :  { %v1308_v6 = vadd.f32 %v2404_v54, %v1307_v49 }
 0x1c8   :  { %v1310_v30 = vpop.f32.mrf.mxu2 }
 0x1c9   :  { %v1311_v34 = vadd.f32 %v2404_v54, %v1310_v30 }
 0x1d0   :  { %v1312_v0 = vpop.f32.mrf.mxu2 }
 0x1d1   :  { %v1313_v27 = vadd.f32 %v2404_v54, %v1312_v0 }
 0x1df   :  { %v1324_v13 = vpop.f32.mrf.mxu3 }
 0x1e0   :  { %v1325_v43 = vadd.f32 %v1324_v13, %v1296_v55 }
 0x1e2   :  { %v1344_v59 = vmax.f32 %v1325_v43, 0.0 }
 0x1e7   :  { %v1326_v56 = vpop.f32.mrf.mxu3 }
 0x1e8   :  { %v1327_v41 = vadd.f32 %v1326_v56, %v1298_v20 }
 0x1ea   :  { %v1345_v3 = vmax.f32 %v1327_v41, 0.0 }
 0x1ec   :  { %v1352_v44 = vpack.c.bf16 %v1345_v3, %v1344_v59 }
 0x1ee   :  { %1432 = vmatmul.bf16.vlgmr.msra.gmra.mxu0 %v1352_v44 }
 0x1ef   :  { %v1329_v37 = vpop.f32.mrf.mxu3 }
 0x1f0   :  { %v1330_v12 = vadd.f32 %v1329_v37, %v1301_v19  ;;  %v3605_v37 = vld [vmem:[%s3661_s8] ss:$0 sm:$0xff] }
 0x1f2   :  { %v1346_v17 = vmax.f32 %v1330_v12, 0.0 }
 0x1f7   :  { %v1331_v50 = vpop.f32.mrf.mxu3 }
 0x1f8   :  { %v1332_v14 = vadd.f32 %v1331_v50, %v1303_v8 }
 0x1fa   :  { %v1347_v57 = vmax.f32 %v1332_v14, 0.0 }
 0x1fc   :  { %v1353_v62 = vpack.c.bf16 %v1347_v57, %v1346_v17 }
 0x1fe   :  { %1437 = vmatmul.bf16.gmra.mxu0 %v1353_v62 }
 0x1ff   :  { %v1334_v33 = vpop.f32.mrf.mxu3 }
 0x200   :  { %v1335_v26 = vadd.f32 %v1334_v33, %v1306_v18 }
 0x202   :  { %v1348_v60 = vmax.f32 %v1335_v26, 0.0 }
 0x207   :  { %v1336_v35 = vpop.f32.mrf.mxu3 }
 0x208   :  { %v1337_v32 = vadd.f32 %v1336_v35, %v1308_v6 }
 0x20a   :  { %v1349_v39 = vmax.f32 %v1337_v32, 0.0 }
 0x20c   :  { %v1354_v31 = vpack.c.bf16 %v1349_v39, %v1348_v60 }
 0x20e   :  { %1442 = vmatmul.bf16.gmra.mxu0 %v1354_v31 }
 0x20f   :  { %v1339_v9 = vpop.f32.mrf.mxu3 }
 0x210   :  { %v1340_v4 = vadd.f32 %v1339_v9, %v1311_v34 }
 0x212   :  { %v1350_v63 = vmax.f32 %v1340_v4, 0.0 }
 0x217   :  { %v1341_v61 = vpop.f32.mrf.mxu3 }
 0x218   :  { %v1342_v10 = vadd.f32 %v1341_v61, %v1313_v27 }
 0x21a   :  { %v1351_v48 = vmax.f32 %v1342_v10, 0.0 }
 0x21c   :  { %v1355_v28 = vpack.c.bf16 %v1351_v48, %v1350_v63 }
 0x21e   :  { %1447 = vmatmul.bf16.gmra.mxu0 %v1355_v28 }
 0x26b   :  { %v1433_v36 = vpop.f32.mrf.mxu0 }
 0x26c   :  { %v1434_v21 = vadd.f32 %v2405_v38, %v1433_v36 }
 0x26e   :  { %v1453_v15 = vmax.f32 %v1434_v21, 0.0 }
 0x273   :  { %v1435_v2 = vpop.f32.mrf.mxu0 }
 0x274   :  { %v1436_v11 = vadd.f32 %v2405_v38, %v1435_v2 }
 0x276   :  { %v1454_v25 = vmax.f32 %v1436_v11, 0.0 }
 0x278   :  { %v1461_v58 = vpack.c.bf16 %v1454_v25, %v1453_v15 }
 0x27a   :  { %2227 = vmatmul.msk.bf16.vlgmr.msra.gmra.mxu1 %vm1501_vm1, %v1461_v58 }
 0x27b   :  { %v1438_v23 = vpop.f32.mrf.mxu0 }
 0x27c   :  { %v1439_v45 = vadd.f32 %v2405_v38, %v1438_v23 }
 0x27e   :  { %v1455_v47 = vmax.f32 %v1439_v45, 0.0 }
 0x283   :  { %v1440_v52 = vpop.f32.mrf.mxu0 }
 0x284   :  { %v1441_v22 = vadd.f32 %v2405_v38, %v1440_v52 }
 0x286   :  { %v1456_v7 = vmax.f32 %v1441_v22, 0.0 }
 0x288   :  { %v1462_v16 = vpack.c.bf16 %v1456_v7, %v1455_v47 }
 0x28a   :  { %2228 = vmatmul.msk.bf16.gmra.mxu1 %vm1501_vm1, %v1462_v16 }
 0x28b   :  { %v1443_v40 = vpop.f32.mrf.mxu0 }
 0x28c   :  { %v1444_v53 = vadd.f32 %v2405_v38, %v1443_v40 }
 0x28e   :  { %v1457_v29 = vmax.f32 %v1444_v53, 0.0 }
 0x293   :  { %v1445_v13 = vpop.f32.mrf.mxu0 }
 0x294   :  { %v1446_v54 = vadd.f32 %v2405_v38, %v1445_v13 }
 0x296   :  { %v1458_v55 = vmax.f32 %v1446_v54, 0.0 }
 0x298   :  { %v1463_v20 = vpack.c.bf16 %v1458_v55, %v1457_v29 }
 0x29a   :  { %2229 = vmatmul.msk.bf16.gmra.mxu1 %vm1501_vm1, %v1463_v20 }
 0x29b   :  { %v1448_v43 = vpop.f32.mrf.mxu0 }
 0x29c   :  { %v1449_v56 = vadd.f32 %v2405_v38, %v1448_v43 }
 0x29e   :  { %v1459_v3 = vmax.f32 %v1449_v56, 0.0 }
 0x2a3   :  { %v1450_v41 = vpop.f32.mrf.mxu0 }
 0x2a4   :  { %v1451_v59 = vadd.f32 %v2405_v38, %v1450_v41 }
 0x2a6   :  { %v1460_v46 = vmax.f32 %v1451_v59, 0.0 }
 0x2a8   :  { %v1464_v44 = vpack.c.bf16 %v1460_v46, %v1459_v3 }
 0x2aa   :  { %2230 = vmatmul.msk.bf16.gmra.mxu1 %vm1501_vm1, %v1464_v44 }
 0x2f7   :  { %v1523_v19 = vpop.f32.mrf.mxu1 }
 0x2f8   :  { %v1524_v5 = vadd.f32 %v3605_v37, %v1523_v19 }
 0x2fa   :  { %v2231_v8 = vmul.f32 -1.442695, %v1524_v5 }
 0x2fc   :  { %2407 = vpow2.f32 %v2231_v8 }
 0x2ff   :  { %v1525_v12 = vpop.f32.mrf.mxu1 }
 0x300   :  { %v1526_v50 = vadd.f32 %v3605_v37, %v1525_v12 }
 0x302   :  { %v2408_v14 = vpop.eup %2407  ;;  %v2232_v17 = vmul.f32 -1.442695, %v1526_v50 }
 0x303   :  { %v1567_v57 = vadd.f32 1.0, %v2408_v14 }
 0x304   :  { %2409 = vpow2.f32 %v2232_v17 }
 0x305   :  { %2411 = vrcp.f32 %v1567_v57  ;;  %vm1580_vm3 = vweird.f32 %v1567_v57  ;;  %v1584_v34 = vand.u32 2147483647, %v1567_v57  ;;  %v1586_v27 = vand.u32 2147483648, %v1567_v57 }
 0x307   :  { %v1528_v62 = vpop.f32.mrf.mxu1  ;;  %vm1585_vm7 = vcmp.eq.f32.partialorder %v1584_v34, 8.507059e+37  ;;  %v1587_v15 = vor.u32 1.1754944e-38, %v1586_v27 }
 0x308   :  { %v1529_v42 = vadd.f32 %v3605_v37, %v1528_v62 }
 0x30a   :  { %v2410_v49 = vpop.eup %2409  ;;  %v2233_v33 = vmul.f32 -1.442695, %v1529_v42 }
 0x30b   :  { %v2412_v1 = vpop.eup %2411  ;;  %v1568_v18 = vadd.f32 1.0, %v2410_v49 }
 0x30c   :  { %v1576_v51 = vmul.f32 %v2412_v1, %v1567_v57  ;;  %2413 = vpow2.f32 %v2233_v33  ;;  %vm1581_vm2 = vweird.f32 %v2412_v1 }
 0x30d   :  { %2415 = vrcp.f32 %v1568_v18  ;;  %v1601_v4 = vand.u32 2147483648, %v1568_v18  ;;  %v1599_v63 = vand.u32 2147483647, %v1568_v18  ;;  %vm3615_vm5 = vmor %vm1580_vm3, %vm1581_vm2  ;;  %vm1595_vm6 = vweird.f32 %v1568_v18 }
 0x30e   :  { %v1577_v6 = vsub.f32 1.0, %v1576_v51 }
 0x30f   :  { %v1530_v26 = vpop.f32.mrf.mxu1  ;;  %v1602_v25 = vor.u32 1.1754944e-38, %v1601_v4  ;;  %vm1600_vm9 = vcmp.eq.f32.partialorder %v1599_v63, 8.507059e+37 }
 0x310   :  { %v1531_v35 = vadd.f32 %v3605_v37, %v1530_v26  ;;  %v1578_v24 = vmul.f32 %v2412_v1, %v1577_v6 }
 0x312   :  { %v2414_v32 = vpop.eup %2413  ;;  %v2234_v30 = vmul.f32 -1.442695, %v1531_v35  ;;  %v1579_v9 = vadd.f32 %v2412_v1, %v1578_v24 }
 0x313   :  { %v2416_v60 = vpop.eup %2415  ;;  %v3611_v39 = vadd.f32 1.0, %v2414_v32 }
 0x314   :  { %v1591_v31 = vmul.f32 %v2416_v60, %v1568_v18  ;;  %2417 = vpow2.f32 %v2234_v30  ;;  %vm1596_vm4 = vweird.f32 %v2416_v60  ;;  %v1583_v38 = vsel %vm3615_vm5, %v2412_v1, %v1579_v9 }
 0x315   :  { %2419 = vrcp.f32 %v3611_v39  ;;  %vm1597_vm8 = vmor %vm1595_vm6, %vm1596_vm4  ;;  %v1588_v52 = vsel %vm1585_vm7, %v1587_v15, %v1583_v38  ;;  %vm1610_vm11 = vweird.f32 %v3611_v39  ;;  %v1614_v41 = vand.u32 2147483647, %v3611_v39 }
 0x316   :  { %v1592_v0 = vsub.f32 1.0, %v1591_v31  ;;  %v1616_v59 = vand.u32 2147483648, %v3611_v39 }
 0x317   :  { %v1533_v61 = vpop.f32.mrf.mxu1  ;;  %vm1615_vm15 = vcmp.eq.f32.partialorder %v1614_v41, 8.507059e+37 }
 0x318   :  { %v1593_v10 = vmul.f32 %v2416_v60, %v1592_v0  ;;  %v1534_v48 = vadd.f32 %v3605_v37, %v1533_v61  ;;  %v1617_v62 = vor.u32 1.1754944e-38, %v1616_v59 }
 0x31a   :  { %v2418_v36 = vpop.eup %2417  ;;  %v1594_v21 = vadd.f32 %v2416_v60, %v1593_v10  ;;  %v2235_v2 = vmul.f32 -1.442695, %v1534_v48 }
 0x31b   :  { %v2420_v11 = vpop.eup %2419  ;;  %v1570_v58 = vadd.f32 1.0, %v2418_v36 }
 0x31c   :  { %v1598_v23 = vsel %vm1597_vm8, %v2416_v60, %v1594_v21  ;;  %v1606_v45 = vmul.f32 %v2420_v11, %v3611_v39  ;;  %2421 = vpow2.f32 %v2235_v2  ;;  %vm1611_vm10 = vweird.f32 %v2420_v11 }
 0x31d   :  { %v1603_v22 = vsel %vm1600_vm9, %v1602_v25, %v1598_v23  ;;  %2423 = vrcp.f32 %v1570_v58  ;;  %v1631_v3 = vand.u32 2147483648, %v1570_v58  ;;  %v1629_v19 = vand.u32 2147483647, %v1570_v58  ;;  %vm3633_vm13 = vmor %vm1610_vm11, %vm1611_vm10 }
 0x31e   :  { %v2368_v47 = vpack.c.bf16 %v1603_v22, %v1588_v52  ;;  %v1607_v7 = vsub.f32 1.0, %v1606_v45  ;;  %vm1625_vm14 = vweird.f32 %v1570_v58 }
 0x31f   :  { %v1535_v16 = vpop.f32.mrf.mxu1  ;;  %v1632_v42 = vor.u32 1.1754944e-38, %v1631_v3  ;;  %vm1630_vm1 = vcmp.eq.f32.partialorder %v1629_v19, 8.507059e+37 }
 0x320   :  { %2369 = vst [vmem:[%s3662_s9] sm:$0xff] %v2368_v47   ;;  %v1536_v40 = vadd.f32 %v3605_v37, %v1535_v16  ;;  %v1608_v13 = vmul.f32 %v2420_v11, %v1607_v7 }
 0x322   :  { %v2422_v53 = vpop.eup %2421  ;;  %v2236_v54 = vmul.f32 -1.442695, %v1536_v40  ;;  %v1609_v43 = vadd.f32 %v2420_v11, %v1608_v13 }
 0x323   :  { %v2424_v29 = vpop.eup %2423  ;;  %v3626_v55 = vadd.f32 1.0, %v2422_v53 }
 0x324   :  { %v1621_v20 = vmul.f32 %v2424_v29, %v1570_v58  ;;  %2425 = vpow2.f32 %v2236_v54  ;;  %vm1626_vm12 = vweird.f32 %v2424_v29  ;;  %v1613_v50 = vsel %vm3633_vm13, %v2420_v11, %v1609_v43 }
 0x325   :  { %2427 = vrcp.f32 %v3626_v55  ;;  %vm1627_vm0 = vmor %vm1625_vm14, %vm1626_vm12  ;;  %v1618_v18 = vsel %vm1615_vm15, %v1617_v62, %v1613_v50  ;;  %vm1640_vm3 = vweird.f32 %v3626_v55  ;;  %v1646_v27 = vand.u32 2147483648, %v3626_v55 }
 0x326   :  { %v1622_v56 = vsub.f32 1.0, %v1621_v20  ;;  %v1644_v61 = vand.u32 2147483647, %v3626_v55 }
 0x327   :  { %v1538_v46 = vpop.f32.mrf.mxu1  ;;  %v1647_v38 = vor.u32 1.1754944e-38, %v1646_v27 }
 0x328   :  { %v1623_v44 = vmul.f32 %v2424_v29, %v1622_v56  ;;  %v1539_v5 = vadd.f32 %v3605_v37, %v1538_v46  ;;  %vm1645_vm8 = vcmp.eq.f32.partialorder %v1644_v61, 8.507059e+37 }
 0x32a   :  { %v2426_v12 = vpop.eup %2425  ;;  %v1624_v14 = vadd.f32 %v2424_v29, %v1623_v44  ;;  %v2237_v17 = vmul.f32 -1.442695, %v1539_v5 }
 0x32b   :  { %v2428_v57 = vpop.eup %2427  ;;  %v1572_v49 = vadd.f32 1.0, %v2426_v12 }
 0x32c   :  { %v1628_v33 = vsel %vm1627_vm0, %v2424_v29, %v1624_v14  ;;  %v1636_v1 = vmul.f32 %v2428_v57, %v3626_v55  ;;  %2429 = vpow2.f32 %v2237_v17  ;;  %vm1641_vm2 = vweird.f32 %v2428_v57 }
 0x32d   :  { %v1633_v51 = vsel %vm1630_vm1, %v1632_v42, %v1628_v33  ;;  %2431 = vrcp.f32 %v1572_v49  ;;  %v1661_v4 = vand.u32 2147483648, %v1572_v49  ;;  %vm1642_vm5 = vmor %vm1640_vm3, %vm1641_vm2  ;;  %vm1655_vm6 = vweird.f32 %v1572_v49 }
 0x32e   :  { %v2373_v6 = vpack.c.bf16 %v1633_v51, %v1618_v18  ;;  %v1637_v26 = vsub.f32 1.0, %v1636_v1 }
 0x32f   :  { %v1540_v35 = vpop.f32.mrf.mxu1  ;;  %v1662_v21 = vor.u32 1.1754944e-38, %v1661_v4 }
 0x330   :  { %2385 = vst [vmem:[%s3662_s9 + $0x8] sm:$0xff] %v2373_v6   ;;  %v1541_v32 = vadd.f32 %v3605_v37, %v1540_v35  ;;  %v1638_v30 = vmul.f32 %v2428_v57, %v1637_v26  ;;  %v1659_v37 = vand.u32 2147483647, %v1572_v49 }
 0x332   :  { %v2430_v24 = vpop.eup %2429  ;;  %v2238_v60 = vmul.f32 -1.442695, %v1541_v32  ;;  %v1639_v0 = vadd.f32 %v2428_v57, %v1638_v30  ;;  %vm1660_vm9 = vcmp.eq.f32.partialorder %v1659_v37, 8.507059e+37 }
 0x333   :  { %v2432_v39 = vpop.eup %2431  ;;  %v1573_v31 = vadd.f32 1.0, %v2430_v24 }
 0x334   :  { %v1651_v9 = vmul.f32 %v2432_v39, %v1572_v49  ;;  %2433 = vpow2.f32 %v2238_v60  ;;  %vm1656_vm4 = vweird.f32 %v2432_v39  ;;  %v1643_v48 = vsel %vm1642_vm5, %v2428_v57, %v1639_v0 }
 0x335   :  { %2435 = vrcp.f32 %v1573_v31  ;;  %vm1657_vm7 = vmor %vm1655_vm6, %vm1656_vm4  ;;  %v1648_v25 = vsel %vm1645_vm8, %v1647_v38, %v1643_v48  ;;  %vm1670_vm11 = vweird.f32 %v1573_v31  ;;  %v1676_v40 = vand.u32 2147483648, %v1573_v31 }
 0x336   :  { %v1652_v34 = vsub.f32 1.0, %v1651_v9  ;;  %v1674_v13 = vand.u32 2147483647, %v1573_v31 }
 0x337   :  { %v1677_v43 = vor.u32 1.1754944e-38, %v1676_v40 }
 0x338   :  { %v1653_v10 = vmul.f32 %v2432_v39, %v1652_v34  ;;  %vm1675_vm0 = vcmp.eq.f32.partialorder %v1674_v13, 8.507059e+37 }
 0x33a   :  { %v2434_v63 = vpop.eup %2433  ;;  %v1654_v28 = vadd.f32 %v2432_v39, %v1653_v10 }
 0x33b   :  { %v2436_v36 = vpop.eup %2435  ;;  %v1574_v2 = vadd.f32 1.0, %v2434_v63 }
 0x33c   :  { %v1658_v11 = vsel %vm1657_vm7, %v2432_v39, %v1654_v28  ;;  %v1666_v15 = vmul.f32 %v2436_v36, %v1573_v31  ;;  %vm1671_vm10 = vweird.f32 %v2436_v36 }
 0x33d   :  { %v1663_v58 = vsel %vm1660_vm9, %v1662_v21, %v1658_v11  ;;  %2437 = vrcp.f32 %v1574_v2  ;;  %v1691_v53 = vand.u32 2147483648, %v1574_v2  ;;  %v1689_v29 = vand.u32 2147483647, %v1574_v2  ;;  %vm1672_vm13 = vmor %vm1670_vm11, %vm1671_vm10 }
 0x33e   :  { %v2378_v23 = vpack.c.bf16 %v1663_v58, %v1648_v25  ;;  %v1667_v45 = vsub.f32 1.0, %v1666_v15  ;;  %vm1685_vm14 = vweird.f32 %v1574_v2 }
 0x33f   :  { %v1692_v56 = vor.u32 1.1754944e-38, %v1691_v53  ;;  %vm1690_vm1 = vcmp.eq.f32.partialorder %v1689_v29, 8.507059e+37 }
 0x340   :  { %2386 = vst [vmem:[%s3662_s9 + $0x10] sm:$0xff] %v2378_v23   ;;  %v1668_v52 = vmul.f32 %v2436_v36, %v1667_v45 }
 0x342   :  { %v1669_v7 = vadd.f32 %v2436_v36, %v1668_v52 }
 0x343   :  { %v2438_v22 = vpop.eup %2437 }
 0x344   :  { %v1681_v47 = vmul.f32 %v2438_v22, %v1574_v2  ;;  %vm1686_vm12 = vweird.f32 %v2438_v22  ;;  %v1673_v55 = vsel %vm1672_vm13, %v2436_v36, %v1669_v7 }
 0x345   :  { %vm1687_vm15 = vmor %vm1685_vm14, %vm1686_vm12  ;;  %v1678_v59 = vsel %vm1675_vm0, %v1677_v43, %v1673_v55 }
 0x346   :  { %v1682_v16 = vsub.f32 1.0, %v1681_v47 }
 0x348   :  { %v1683_v54 = vmul.f32 %v2438_v22, %v1682_v16 }
 0x34a   :  { %v1684_v20 = vadd.f32 %v2438_v22, %v1683_v54 }
 0x34c   :  { %v1688_v41 = vsel %vm1687_vm15, %v2438_v22, %v1684_v20 }
 0x34d   :  { %v1693_v3 = vsel %vm1690_vm1, %v1692_v56, %v1688_v41 }
 0x34e   :  { %v2383_v46 = vpack.c.bf16 %v1693_v3, %v1678_v59 }
 0x350   :  { %2387 = vst [vmem:[%s3662_s9 + $0x18] sm:$0xff] %v2383_v46  }

</bundles_post_ra>
